<compile_context>
chip_gen: v5e
topology: v5e:2x2
jax: 0.10.0
libtpu: 0.0.40
codegen_flags: <defaults>
</compile_context>

<pallas_src>
import numpy as np
import jax
import jax.numpy as jnp
from jax.experimental import pallas as pl
from jax.experimental.pallas import tpu as pltpu

WINDOW = 5
HIDDEN = WINDOW * WINDOW          # 25
NUM_LAYERS = 2
GATES = 4 * HIDDEN                # 100 (i, f, g, o)


# ----------------------------------------------------------------------------
# Pallas kernel: one invocation processes the whole sequence.
# ----------------------------------------------------------------------------
def _lstm_cnn_kernel(x_ref, w0_ref, b0_ref, w1_ref, b1_ref,
                     m1_ref, cb1_ref, m2_ref, cb2_ref, out_ref):
    t_steps = x_ref.shape[0]

    # Weights are tiny (<100 KB total); load once, outside the recurrence.
    w0 = w0_ref[...]; b0 = b0_ref[...]
    w1 = w1_ref[...]; b1 = b1_ref[...]
    m1 = m1_ref[...]; cb1 = cb1_ref[...]
    m2 = m2_ref[...]; cb2 = cb2_ref[...]

    def cell(xh, c_prev, w, b):
        # fused [x, h_prev] @ [W_ih; W_hh] : one MXU push per cell
        g = jnp.dot(xh, w, preferred_element_type=jnp.float32) + b   # (1, 4H)
        sg = jax.nn.sigmoid(g)     # one EUP launch covers i, f, o
        tg = jnp.tanh(g)           # one EUP launch covers the g-gate
        i = sg[:, 0:HIDDEN]
        f = sg[:, HIDDEN:2 * HIDDEN]
        o = sg[:, 3 * HIDDEN:4 * HIDDEN]
        gg = tg[:, 2 * HIDDEN:3 * HIDDEN]
        c_new = f * c_prev + i * gg
        h_new = o * jnp.tanh(c_new)
        return h_new, c_new

    def step(t, carry):
        h0, h1, c0, c1 = carry
        x_t = x_ref[t]                                               # (1, d)

        nh0, nc0 = cell(jnp.concatenate([x_t, h0], axis=1), c0, w0, b0)
        nh1, nc1 = cell(jnp.concatenate([nh0, h1], axis=1), c1, w1, b1)

        # conv1(3x3, pad=1) -> relu -> conv2(3x3, pad=1) -> sigmoid on the
        # (1, 2, 5, 5) tensor built from c_n, expressed as dense matmuls on
        # the flattened (1, 50) channel vector (single dot per conv layer).
        cvec = jnp.concatenate([nc0, nc1], axis=1)                   # (1, 50)
        z1 = jnp.maximum(
            jnp.dot(cvec, m1, preferred_element_type=jnp.float32) + cb1, 0.0)
        z2 = jax.nn.sigmoid(
            jnp.dot(z1, m2, preferred_element_type=jnp.float32) + cb2)  # (1, 50)

        # output[:, step, :, :] = lstm_out (top-layer hidden), staged in VMEM;
        # the HBM writeback happens once after the kernel body.
        out_ref[t] = nh1

        # carry: h_n from the LSTM, c_n replaced by the CNN output (as in forward())
        return (nh0, nh1, z2[:, 0:HIDDEN], z2[:, HIDDEN:2 * HIDDEN])

    zero = jnp.zeros((1, HIDDEN), jnp.float32)
    # Static, short trip count -> fully unrolled for LLO scheduling visibility.
    jax.lax.fori_loop(0, t_steps, step, (zero, zero, zero, zero), unroll=True)


# ----------------------------------------------------------------------------
# Host-side glue
# ----------------------------------------------------------------------------
def conv3x3_to_matrix(w, b):
    """Convert a 3x3 / pad=1 conv on (C, 5, 5) into a dense matrix acting on
    the flattened channel vector.  w: (Cout, Cin, 3, 3); returns
    M: (Cin*25, Cout*25), bias: (1, Cout*25)."""
    w = np.asarray(w, np.float32)
    b = np.asarray(b, np.float32)
    cout, cin, _, _ = w.shape
    m = np.zeros((cin * HIDDEN, cout * HIDDEN), dtype=np.float32)
    for o in range(cout):
        for c in range(cin):
            for y in range(WINDOW):
                for x in range(WINDOW):
                    for dy in range(3):
                        for dx in range(3):
                            iy, ix = y + dy - 1, x + dx - 1
                            if 0 <= iy < WINDOW and 0 <= ix < WINDOW:
                                m[c * HIDDEN + iy * WINDOW + ix,
                                  o * HIDDEN + y * WINDOW + x] += w[o, c, dy, dx]
    bias = np.repeat(b, HIDDEN)[None, :]
    return jnp.asarray(m), jnp.asarray(bias)


def init_params(input_size, key):
    ks = jax.random.split(key, 12)
    s = 1.0 / np.sqrt(HIDDEN)
    u = lambda k, shape: jax.random.uniform(k, shape, jnp.float32, -s, s)
    return {
        # LSTM weights stored pre-transposed: x @ W_ih.T -> x @ wih
        "wih0": u(ks[0], (input_size, GATES)),
        "whh0": u(ks[1], (HIDDEN, GATES)),
        "b0":   u(ks[2], (1, GATES)) + u(ks[3], (1, GATES)),   # b_ih + b_hh
        "wih1": u(ks[4], (HIDDEN, GATES)),
        "whh1": u(ks[5], (HIDDEN, GATES)),
        "b1":   u(ks[6], (1, GATES)) + u(ks[7], (1, GATES)),
        "convW1": u(ks[8], (WINDOW, NUM_LAYERS, 3, 3)),
        "convb1": u(ks[9], (WINDOW,)),
        "convW2": u(ks[10], (NUM_LAYERS, WINDOW, 3, 3)),
        "convb2": u(ks[11], (NUM_LAYERS,)),
    }


def prepare_params(p):
    """Build kernel-ready fused weights ONCE (fused [W_ih; W_hh] per layer,
    conv layers lowered to dense matrices).  Do not call per forward pass."""
    m1, cb1 = conv3x3_to_matrix(p["convW1"], p["convb1"])
    m2, cb2 = conv3x3_to_matrix(p["convW2"], p["convb2"])
    return {
        "w0": jnp.concatenate([p["wih0"], p["whh0"]], axis=0),  # (d+25, 100)
        "b0": p["b0"],
        "w1": jnp.concatenate([p["wih1"], p["whh1"]], axis=0),  # (50, 100)
        "b1": p["b1"],
        "m1": m1, "cb1": cb1,                                   # (50, 125), (1, 125)
        "m2": m2, "cb2": cb2,                                   # (125, 50), (1, 50)
    }


@jax.jit
def lstm_cnn_forward(x, kp):
    """x: (batch=1, T, input_size) -> (1, T, 5, 5), matching the PyTorch forward."""
    b, t_steps, d = x.shape
    assert b == 1, "module's .view() reshuffles assume batch_size == 1"
    x_seq = jnp.asarray(x, jnp.float32).reshape(t_steps, 1, d)

    # Single invocation: no grid; all operands/outputs are whole-array VMEM
    # residents (total footprint << VMEM on v5e/v6e/v7x).
    out = pl.pallas_call(
        _lstm_cnn_kernel,
        out_shape=jax.ShapeDtypeStruct((t_steps, 1, HIDDEN), jnp.float32),
    )(x_seq, kp["w0"], kp["b0"], kp["w1"], kp["b1"],
      kp["m1"], kp["cb1"], kp["m2"], kp["cb2"])

    return out.reshape(1, t_steps, WINDOW, WINDOW)


# ----------------------------------------------------------------------------
# Pure-JAX reference (mirrors the PyTorch forward, uses real convs)
# ----------------------------------------------------------------------------
def ref_forward(x, p):
    b, t_steps, _ = x.shape
    h = jnp.zeros((NUM_LAYERS, b, HIDDEN), jnp.float32)
    c = jnp.zeros((NUM_LAYERS, b, HIDDEN), jnp.float32)
    outs = []

    def cell(inp, hh, cc, wih, whh, bb):
        g = inp @ wih + hh @ whh + bb
        i = jax.nn.sigmoid(g[:, 0:HIDDEN])
        f = jax.nn.sigmoid(g[:, HIDDEN:2 * HIDDEN])
        gg = jnp.tanh(g[:, 2 * HIDDEN:3 * HIDDEN])
        o = jax.nn.sigmoid(g[:, 3 * HIDDEN:4 * HIDDEN])
        cn = f * cc + i * gg
        return o * jnp.tanh(cn), cn

    for t in range(t_steps):
        xt = x[:, t, :].astype(jnp.float32)
        h0, c0 = cell(xt, h[0], c[0], p["wih0"], p["whh0"], p["b0"])
        h1, c1 = cell(h0, h[1], c[1], p["wih1"], p["whh1"], p["b1"])
        h = jnp.stack([h0, h1])
        cnn_in = jnp.stack([c0, c1]).reshape(b, NUM_LAYERS, WINDOW, WINDOW)
        z = jax.lax.conv_general_dilated(cnn_in, p["convW1"], (1, 1), "SAME",
                                         dimension_numbers=("NCHW", "OIHW", "NCHW"))
        z = jnp.maximum(z + p["convb1"][None, :, None, None], 0.0)
        z = jax.lax.conv_general_dilated(z, p["convW2"], (1, 1), "SAME",
                                         dimension_numbers=("NCHW", "OIHW", "NCHW"))
        z = jax.nn.sigmoid(z + p["convb2"][None, :, None, None])
        c = z.reshape(NUM_LAYERS, b, HIDDEN)
        outs.append(h1.reshape(b, WINDOW, WINDOW))
    return jnp.stack(outs, axis=1)


if __name__ == "__main__":
    key = jax.random.PRNGKey(0)
    pkey, xkey = jax.random.split(key)

    input_size = 32      # flattened per-step feature size (concat(static, dynamic))
    time_steps = 8
    batch = 1            # module's .view() logic requires batch_size == 1

    raw_params = init_params(input_size, pkey)
    kernel_params = prepare_params(raw_params)   # built once, cached
    x = jax.random.normal(xkey, (batch, time_steps, input_size), jnp.float32)

    out = jax.block_until_ready(lstm_cnn_forward(x, kernel_params))
    ref = jax.block_until_ready(ref_forward(x, raw_params))

    assert out.shape == (batch, time_steps, WINDOW, WINDOW)
    # loose tolerance: MXU f32 default-precision matmul vs. XLA conv reference
    np.testing.assert_allclose(np.asarray(out), np.asarray(ref), rtol=1e-2, atol=1e-2)
    print("KERNEL_OK")
</pallas_src>

<mosaic_0001>
module attributes {stable_mosaic.version = 11 : i64} {
  func.func @_lstm_cnn_kernel(%arg0: memref<8x1x32xf32, #tpu.memory_space<vmem>>, %arg1: memref<57x100xf32, #tpu.memory_space<vmem>>, %arg2: memref<1x100xf32, #tpu.memory_space<vmem>>, %arg3: memref<50x100xf32, #tpu.memory_space<vmem>>, %arg4: memref<1x100xf32, #tpu.memory_space<vmem>>, %arg5: memref<50x125xf32, #tpu.memory_space<vmem>>, %arg6: memref<1x125xf32, #tpu.memory_space<vmem>>, %arg7: memref<125x50xf32, #tpu.memory_space<vmem>>, %arg8: memref<1x50xf32, #tpu.memory_space<vmem>>, %arg9: memref<8x1x25xf32, #tpu.memory_space<vmem>>) attributes {dimension_semantics = [], scalar_prefetch = 0 : i64, scratch_operands = 0 : i64, tpu.core_type = #tpu.core_type<tc>} {
    %c0 = arith.constant 0 : index
    %c0_0 = arith.constant 0 : index
    %0 = vector.load %arg1[%c0, %c0_0] : memref<57x100xf32, #tpu.memory_space<vmem>>, vector<57x100xf32>
    %c0_1 = arith.constant 0 : index
    %c0_2 = arith.constant 0 : index
    %1 = vector.load %arg2[%c0_1, %c0_2] : memref<1x100xf32, #tpu.memory_space<vmem>>, vector<1x100xf32>
    %c0_3 = arith.constant 0 : index
    %c0_4 = arith.constant 0 : index
    %2 = vector.load %arg3[%c0_3, %c0_4] : memref<50x100xf32, #tpu.memory_space<vmem>>, vector<50x100xf32>
    %c0_5 = arith.constant 0 : index
    %c0_6 = arith.constant 0 : index
    %3 = vector.load %arg4[%c0_5, %c0_6] : memref<1x100xf32, #tpu.memory_space<vmem>>, vector<1x100xf32>
    %c0_7 = arith.constant 0 : index
    %c0_8 = arith.constant 0 : index
    %4 = vector.load %arg5[%c0_7, %c0_8] : memref<50x125xf32, #tpu.memory_space<vmem>>, vector<50x125xf32>
    %c0_9 = arith.constant 0 : index
    %c0_10 = arith.constant 0 : index
    %5 = vector.load %arg6[%c0_9, %c0_10] : memref<1x125xf32, #tpu.memory_space<vmem>>, vector<1x125xf32>
    %c0_11 = arith.constant 0 : index
    %c0_12 = arith.constant 0 : index
    %6 = vector.load %arg7[%c0_11, %c0_12] : memref<125x50xf32, #tpu.memory_space<vmem>>, vector<125x50xf32>
    %c0_13 = arith.constant 0 : index
    %c0_14 = arith.constant 0 : index
    %7 = vector.load %arg8[%c0_13, %c0_14] : memref<1x50xf32, #tpu.memory_space<vmem>>, vector<1x50xf32>
    %cst = arith.constant 0.000000e+00 : f32
    %8 = vector.broadcast %cst : f32 to vector<1x25xf32>
    %c0_i32 = arith.constant 0 : i32
    %9 = arith.index_cast %c0_i32 : i32 to index
    %c0_15 = arith.constant 0 : index
    %c0_16 = arith.constant 0 : index
    %10 = vector.load %arg0[%9, %c0_15, %c0_16] : memref<8x1x32xf32, #tpu.memory_space<vmem>>, vector<1x1x32xf32>
    %11 = vector.shape_cast %10 : vector<1x1x32xf32> to vector<1x32xf32>
    %12 = tpu.concatenate %11, %8 in 1 : vector<1x32xf32>, vector<1x25xf32> -> vector<1x57xf32>
    %cst_17 = arith.constant dense<0.000000e+00> : vector<1x100xf32>
    %13 = tpu.matmul %12, %0, %cst_17 {dimension_numbers = #tpu.dot_dimension_numbers<[1], [0], [0], [1], [0, 0, 1, 1], [], []>} : vector<1x57xf32>, vector<57x100xf32>, vector<1x100xf32> -> vector<1x100xf32>
    %14 = arith.addf %13, %1 : vector<1x100xf32>
    %15 = arith.negf %14 : vector<1x100xf32>
    %16 = math.exp %15 : vector<1x100xf32>
    %cst_18 = arith.constant 1.000000e+00 : f32
    %17 = vector.broadcast %cst_18 : f32 to vector<1x100xf32>
    %18 = arith.addf %17, %16 : vector<1x100xf32>
    %19 = arith.divf %17, %18 : vector<1x100xf32>
    %20 = math.tanh %14 : vector<1x100xf32>
    %21 = vector.extract_strided_slice %19 {offsets = [0, 0], sizes = [1, 25], strides = [1, 1]} : vector<1x100xf32> to vector<1x25xf32>
    %22 = vector.extract_strided_slice %19 {offsets = [0, 25], sizes = [1, 25], strides = [1, 1]} : vector<1x100xf32> to vector<1x25xf32>
    %23 = vector.extract_strided_slice %19 {offsets = [0, 75], sizes = [1, 25], strides = [1, 1]} : vector<1x100xf32> to vector<1x25xf32>
    %24 = vector.extract_strided_slice %20 {offsets = [0, 50], sizes = [1, 25], strides = [1, 1]} : vector<1x100xf32> to vector<1x25xf32>
    %25 = arith.mulf %22, %8 : vector<1x25xf32>
    %26 = arith.mulf %21, %24 : vector<1x25xf32>
    %27 = arith.addf %25, %26 : vector<1x25xf32>
    %28 = math.tanh %27 : vector<1x25xf32>
    %29 = arith.mulf %23, %28 : vector<1x25xf32>
    %30 = tpu.concatenate %29, %8 in 1 : vector<1x25xf32>, vector<1x25xf32> -> vector<1x50xf32>
    %cst_19 = arith.constant dense<0.000000e+00> : vector<1x100xf32>
    %31 = tpu.matmul %30, %2, %cst_19 {dimension_numbers = #tpu.dot_dimension_numbers<[1], [0], [0], [1], [0, 0, 1, 1], [], []>} : vector<1x50xf32>, vector<50x100xf32>, vector<1x100xf32> -> vector<1x100xf32>
    %32 = arith.addf %31, %3 : vector<1x100xf32>
    %33 = arith.negf %32 : vector<1x100xf32>
    %34 = math.exp %33 : vector<1x100xf32>
    %cst_20 = arith.constant 1.000000e+00 : f32
    %35 = vector.broadcast %cst_20 : f32 to vector<1x100xf32>
    %36 = arith.addf %35, %34 : vector<1x100xf32>
    %37 = arith.divf %35, %36 : vector<1x100xf32>
    %38 = math.tanh %32 : vector<1x100xf32>
    %39 = vector.extract_strided_slice %37 {offsets = [0, 0], sizes = [1, 25], strides = [1, 1]} : vector<1x100xf32> to vector<1x25xf32>
    %40 = vector.extract_strided_slice %37 {offsets = [0, 25], sizes = [1, 25], strides = [1, 1]} : vector<1x100xf32> to vector<1x25xf32>
    %41 = vector.extract_strided_slice %37 {offsets = [0, 75], sizes = [1, 25], strides = [1, 1]} : vector<1x100xf32> to vector<1x25xf32>
    %42 = vector.extract_strided_slice %38 {offsets = [0, 50], sizes = [1, 25], strides = [1, 1]} : vector<1x100xf32> to vector<1x25xf32>
    %43 = arith.mulf %40, %8 : vector<1x25xf32>
    %44 = arith.mulf %39, %42 : vector<1x25xf32>
    %45 = arith.addf %43, %44 : vector<1x25xf32>
    %46 = math.tanh %45 : vector<1x25xf32>
    %47 = arith.mulf %41, %46 : vector<1x25xf32>
    %48 = tpu.concatenate %27, %45 in 1 : vector<1x25xf32>, vector<1x25xf32> -> vector<1x50xf32>
    %cst_21 = arith.constant dense<0.000000e+00> : vector<1x125xf32>
    %49 = tpu.matmul %48, %4, %cst_21 {dimension_numbers = #tpu.dot_dimension_numbers<[1], [0], [0], [1], [0, 0, 1, 1], [], []>} : vector<1x50xf32>, vector<50x125xf32>, vector<1x125xf32> -> vector<1x125xf32>
    %50 = arith.addf %49, %5 : vector<1x125xf32>
    %cst_22 = arith.constant 0.000000e+00 : f32
    %51 = vector.broadcast %cst_22 : f32 to vector<1x125xf32>
    %52 = arith.maximumf %50, %51 : vector<1x125xf32>
    %cst_23 = arith.constant dense<0.000000e+00> : vector<1x50xf32>
    %53 = tpu.matmul %52, %6, %cst_23 {dimension_numbers = #tpu.dot_dimension_numbers<[1], [0], [0], [1], [0, 0, 1, 1], [], []>} : vector<1x125xf32>, vector<125x50xf32>, vector<1x50xf32> -> vector<1x50xf32>
    %54 = arith.addf %53, %7 : vector<1x50xf32>
    %55 = arith.negf %54 : vector<1x50xf32>
    %56 = math.exp %55 : vector<1x50xf32>
    %cst_24 = arith.constant 1.000000e+00 : f32
    %57 = vector.broadcast %cst_24 : f32 to vector<1x50xf32>
    %58 = arith.addf %57, %56 : vector<1x50xf32>
    %59 = arith.divf %57, %58 : vector<1x50xf32>
    %60 = arith.index_cast %c0_i32 : i32 to index
    %c0_25 = arith.constant 0 : index
    %c0_26 = arith.constant 0 : index
    %61 = vector.load %arg9[%60, %c0_25, %c0_26] : memref<8x1x25xf32, #tpu.memory_space<vmem>>, vector<1x1x25xf32>
    %62 = vector.shape_cast %61 : vector<1x1x25xf32> to vector<1x25xf32>
    %63 = vector.shape_cast %47 : vector<1x25xf32> to vector<1x1x25xf32>
    tpu.vector_store %arg9[%60, %c0_25, %c0_26], %63 {strides = array<i32>} : memref<8x1x25xf32, #tpu.memory_space<vmem>>, vector<1x1x25xf32>,
    %64 = vector.extract_strided_slice %59 {offsets = [0, 0], sizes = [1, 25], strides = [1, 1]} : vector<1x50xf32> to vector<1x25xf32>
    %65 = vector.extract_strided_slice %59 {offsets = [0, 25], sizes = [1, 25], strides = [1, 1]} : vector<1x50xf32> to vector<1x25xf32>
    %c1_i32 = arith.constant 1 : i32
    %66 = arith.index_cast %c1_i32 : i32 to index
    %c0_27 = arith.constant 0 : index
    %c0_28 = arith.constant 0 : index
    %67 = vector.load %arg0[%66, %c0_27, %c0_28] : memref<8x1x32xf32, #tpu.memory_space<vmem>>, vector<1x1x32xf32>
    %68 = vector.shape_cast %67 : vector<1x1x32xf32> to vector<1x32xf32>
    %69 = tpu.concatenate %68, %29 in 1 : vector<1x32xf32>, vector<1x25xf32> -> vector<1x57xf32>
    %cst_29 = arith.constant dense<0.000000e+00> : vector<1x100xf32>
    %70 = tpu.matmul %69, %0, %cst_29 {dimension_numbers = #tpu.dot_dimension_numbers<[1], [0], [0], [1], [0, 0, 1, 1], [], []>} : vector<1x57xf32>, vector<57x100xf32>, vector<1x100xf32> -> vector<1x100xf32>
    %71 = arith.addf %70, %1 : vector<1x100xf32>
    %72 = arith.negf %71 : vector<1x100xf32>
    %73 = math.exp %72 : vector<1x100xf32>
    %cst_30 = arith.constant 1.000000e+00 : f32
    %74 = vector.broadcast %cst_30 : f32 to vector<1x100xf32>
    %75 = arith.addf %74, %73 : vector<1x100xf32>
    %76 = arith.divf %74, %75 : vector<1x100xf32>
    %77 = math.tanh %71 : vector<1x100xf32>
    %78 = vector.extract_strided_slice %76 {offsets = [0, 0], sizes = [1, 25], strides = [1, 1]} : vector<1x100xf32> to vector<1x25xf32>
    %79 = vector.extract_strided_slice %76 {offsets = [0, 25], sizes = [1, 25], strides = [1, 1]} : vector<1x100xf32> to vector<1x25xf32>
    %80 = vector.extract_strided_slice %76 {offsets = [0, 75], sizes = [1, 25], strides = [1, 1]} : vector<1x100xf32> to vector<1x25xf32>
    %81 = vector.extract_strided_slice %77 {offsets = [0, 50], sizes = [1, 25], strides = [1, 1]} : vector<1x100xf32> to vector<1x25xf32>
    %82 = arith.mulf %79, %64 : vector<1x25xf32>
    %83 = arith.mulf %78, %81 : vector<1x25xf32>
    %84 = arith.addf %82, %83 : vector<1x25xf32>
    %85 = math.tanh %84 : vector<1x25xf32>
    %86 = arith.mulf %80, %85 : vector<1x25xf32>
    %87 = tpu.concatenate %86, %47 in 1 : vector<1x25xf32>, vector<1x25xf32> -> vector<1x50xf32>
    %cst_31 = arith.constant dense<0.000000e+00> : vector<1x100xf32>
    %88 = tpu.matmul %87, %2, %cst_31 {dimension_numbers = #tpu.dot_dimension_numbers<[1], [0], [0], [1], [0, 0, 1, 1], [], []>} : vector<1x50xf32>, vector<50x100xf32>, vector<1x100xf32> -> vector<1x100xf32>
    %89 = arith.addf %88, %3 : vector<1x100xf32>
    %90 = arith.negf %89 : vector<1x100xf32>
    %91 = math.exp %90 : vector<1x100xf32>
    %cst_32 = arith.constant 1.000000e+00 : f32
    %92 = vector.broadcast %cst_32 : f32 to vector<1x100xf32>
    %93 = arith.addf %92, %91 : vector<1x100xf32>
    %94 = arith.divf %92, %93 : vector<1x100xf32>
    %95 = math.tanh %89 : vector<1x100xf32>
    %96 = vector.extract_strided_slice %94 {offsets = [0, 0], sizes = [1, 25], strides = [1, 1]} : vector<1x100xf32> to vector<1x25xf32>
    %97 = vector.extract_strided_slice %94 {offsets = [0, 25], sizes = [1, 25], strides = [1, 1]} : vector<1x100xf32> to vector<1x25xf32>
    %98 = vector.extract_strided_slice %94 {offsets = [0, 75], sizes = [1, 25], strides = [1, 1]} : vector<1x100xf32> to vector<1x25xf32>
    %99 = vector.extract_strided_slice %95 {offsets = [0, 50], sizes = [1, 25], strides = [1, 1]} : vector<1x100xf32> to vector<1x25xf32>
    %100 = arith.mulf %97, %65 : vector<1x25xf32>
    %101 = arith.mulf %96, %99 : vector<1x25xf32>
    %102 = arith.addf %100, %101 : vector<1x25xf32>
    %103 = math.tanh %102 : vector<1x25xf32>
    %104 = arith.mulf %98, %103 : vector<1x25xf32>
    %105 = tpu.concatenate %84, %102 in 1 : vector<1x25xf32>, vector<1x25xf32> -> vector<1x50xf32>
    %cst_33 = arith.constant dense<0.000000e+00> : vector<1x125xf32>
    %106 = tpu.matmul %105, %4, %cst_33 {dimension_numbers = #tpu.dot_dimension_numbers<[1], [0], [0], [1], [0, 0, 1, 1], [], []>} : vector<1x50xf32>, vector<50x125xf32>, vector<1x125xf32> -> vector<1x125xf32>
    %107 = arith.addf %106, %5 : vector<1x125xf32>
    %cst_34 = arith.constant 0.000000e+00 : f32
    %108 = vector.broadcast %cst_34 : f32 to vector<1x125xf32>
    %109 = arith.maximumf %107, %108 : vector<1x125xf32>
    %cst_35 = arith.constant dense<0.000000e+00> : vector<1x50xf32>
    %110 = tpu.matmul %109, %6, %cst_35 {dimension_numbers = #tpu.dot_dimension_numbers<[1], [0], [0], [1], [0, 0, 1, 1], [], []>} : vector<1x125xf32>, vector<125x50xf32>, vector<1x50xf32> -> vector<1x50xf32>
    %111 = arith.addf %110, %7 : vector<1x50xf32>
    %112 = arith.negf %111 : vector<1x50xf32>
    %113 = math.exp %112 : vector<1x50xf32>
    %cst_36 = arith.constant 1.000000e+00 : f32
    %114 = vector.broadcast %cst_36 : f32 to vector<1x50xf32>
    %115 = arith.addf %114, %113 : vector<1x50xf32>
    %116 = arith.divf %114, %115 : vector<1x50xf32>
    %117 = arith.index_cast %c1_i32 : i32 to index
    %c0_37 = arith.constant 0 : index
    %c0_38 = arith.constant 0 : index
    %118 = vector.load %arg9[%117, %c0_37, %c0_38] : memref<8x1x25xf32, #tpu.memory_space<vmem>>, vector<1x1x25xf32>
    %119 = vector.shape_cast %118 : vector<1x1x25xf32> to vector<1x25xf32>
    %120 = vector.shape_cast %104 : vector<1x25xf32> to vector<1x1x25xf32>
    tpu.vector_store %arg9[%117, %c0_37, %c0_38], %120 {strides = array<i32>} : memref<8x1x25xf32, #tpu.memory_space<vmem>>, vector<1x1x25xf32>,
    %121 = vector.extract_strided_slice %116 {offsets = [0, 0], sizes = [1, 25], strides = [1, 1]} : vector<1x50xf32> to vector<1x25xf32>
    %122 = vector.extract_strided_slice %116 {offsets = [0, 25], sizes = [1, 25], strides = [1, 1]} : vector<1x50xf32> to vector<1x25xf32>
    %c2_i32 = arith.constant 2 : i32
    %123 = arith.index_cast %c2_i32 : i32 to index
    %c0_39 = arith.constant 0 : index
    %c0_40 = arith.constant 0 : index
    %124 = vector.load %arg0[%123, %c0_39, %c0_40] : memref<8x1x32xf32, #tpu.memory_space<vmem>>, vector<1x1x32xf32>
    %125 = vector.shape_cast %124 : vector<1x1x32xf32> to vector<1x32xf32>
    %126 = tpu.concatenate %125, %86 in 1 : vector<1x32xf32>, vector<1x25xf32> -> vector<1x57xf32>
    %cst_41 = arith.constant dense<0.000000e+00> : vector<1x100xf32>
    %127 = tpu.matmul %126, %0, %cst_41 {dimension_numbers = #tpu.dot_dimension_numbers<[1], [0], [0], [1], [0, 0, 1, 1], [], []>} : vector<1x57xf32>, vector<57x100xf32>, vector<1x100xf32> -> vector<1x100xf32>
    %128 = arith.addf %127, %1 : vector<1x100xf32>
    %129 = arith.negf %128 : vector<1x100xf32>
    %130 = math.exp %129 : vector<1x100xf32>
    %cst_42 = arith.constant 1.000000e+00 : f32
    %131 = vector.broadcast %cst_42 : f32 to vector<1x100xf32>
    %132 = arith.addf %131, %130 : vector<1x100xf32>
    %133 = arith.divf %131, %132 : vector<1x100xf32>
    %134 = math.tanh %128 : vector<1x100xf32>
    %135 = vector.extract_strided_slice %133 {offsets = [0, 0], sizes = [1, 25], strides = [1, 1]} : vector<1x100xf32> to vector<1x25xf32>
    %136 = vector.extract_strided_slice %133 {offsets = [0, 25], sizes = [1, 25], strides = [1, 1]} : vector<1x100xf32> to vector<1x25xf32>
    %137 = vector.extract_strided_slice %133 {offsets = [0, 75], sizes = [1, 25], strides = [1, 1]} : vector<1x100xf32> to vector<1x25xf32>
    %138 = vector.extract_strided_slice %134 {offsets = [0, 50], sizes = [1, 25], strides = [1, 1]} : vector<1x100xf32> to vector<1x25xf32>
    %139 = arith.mulf %136, %121 : vector<1x25xf32>
    %140 = arith.mulf %135, %138 : vector<1x25xf32>
    %141 = arith.addf %139, %140 : vector<1x25xf32>
    %142 = math.tanh %141 : vector<1x25xf32>
    %143 = arith.mulf %137, %142 : vector<1x25xf32>
    %144 = tpu.concatenate %143, %104 in 1 : vector<1x25xf32>, vector<1x25xf32> -> vector<1x50xf32>
    %cst_43 = arith.constant dense<0.000000e+00> : vector<1x100xf32>
    %145 = tpu.matmul %144, %2, %cst_43 {dimension_numbers = #tpu.dot_dimension_numbers<[1], [0], [0], [1], [0, 0, 1, 1], [], []>} : vector<1x50xf32>, vector<50x100xf32>, vector<1x100xf32> -> vector<1x100xf32>
    %146 = arith.addf %145, %3 : vector<1x100xf32>
    %147 = arith.negf %146 : vector<1x100xf32>
    %148 = math.exp %147 : vector<1x100xf32>
    %cst_44 = arith.constant 1.000000e+00 : f32
    %149 = vector.broadcast %cst_44 : f32 to vector<1x100xf32>
    %150 = arith.addf %149, %148 : vector<1x100xf32>
    %151 = arith.divf %149, %150 : vector<1x100xf32>
    %152 = math.tanh %146 : vector<1x100xf32>
    %153 = vector.extract_strided_slice %151 {offsets = [0, 0], sizes = [1, 25], strides = [1, 1]} : vector<1x100xf32> to vector<1x25xf32>
    %154 = vector.extract_strided_slice %151 {offsets = [0, 25], sizes = [1, 25], strides = [1, 1]} : vector<1x100xf32> to vector<1x25xf32>
    %155 = vector.extract_strided_slice %151 {offsets = [0, 75], sizes = [1, 25], strides = [1, 1]} : vector<1x100xf32> to vector<1x25xf32>
    %156 = vector.extract_strided_slice %152 {offsets = [0, 50], sizes = [1, 25], strides = [1, 1]} : vector<1x100xf32> to vector<1x25xf32>
    %157 = arith.mulf %154, %122 : vector<1x25xf32>
    %158 = arith.mulf %153, %156 : vector<1x25xf32>
    %159 = arith.addf %157, %158 : vector<1x25xf32>
    %160 = math.tanh %159 : vector<1x25xf32>
    %161 = arith.mulf %155, %160 : vector<1x25xf32>
    %162 = tpu.concatenate %141, %159 in 1 : vector<1x25xf32>, vector<1x25xf32> -> vector<1x50xf32>
    %cst_45 = arith.constant dense<0.000000e+00> : vector<1x125xf32>
    %163 = tpu.matmul %162, %4, %cst_45 {dimension_numbers = #tpu.dot_dimension_numbers<[1], [0], [0], [1], [0, 0, 1, 1], [], []>} : vector<1x50xf32>, vector<50x125xf32>, vector<1x125xf32> -> vector<1x125xf32>
    %164 = arith.addf %163, %5 : vector<1x125xf32>
    %cst_46 = arith.constant 0.000000e+00 : f32
    %165 = vector.broadcast %cst_46 : f32 to vector<1x125xf32>
    %166 = arith.maximumf %164, %165 : vector<1x125xf32>
    %cst_47 = arith.constant dense<0.000000e+00> : vector<1x50xf32>
    %167 = tpu.matmul %166, %6, %cst_47 {dimension_numbers = #tpu.dot_dimension_numbers<[1], [0], [0], [1], [0, 0, 1, 1], [], []>} : vector<1x125xf32>, vector<125x50xf32>, vector<1x50xf32> -> vector<1x50xf32>
    %168 = arith.addf %167, %7 : vector<1x50xf32>
    %169 = arith.negf %168 : vector<1x50xf32>
    %170 = math.exp %169 : vector<1x50xf32>
    %cst_48 = arith.constant 1.000000e+00 : f32
    %171 = vector.broadcast %cst_48 : f32 to vector<1x50xf32>
    %172 = arith.addf %171, %170 : vector<1x50xf32>
    %173 = arith.divf %171, %172 : vector<1x50xf32>
    %174 = arith.index_cast %c2_i32 : i32 to index
    %c0_49 = arith.constant 0 : index
    %c0_50 = arith.constant 0 : index
    %175 = vector.load %arg9[%174, %c0_49, %c0_50] : memref<8x1x25xf32, #tpu.memory_space<vmem>>, vector<1x1x25xf32>
    %176 = vector.shape_cast %175 : vector<1x1x25xf32> to vector<1x25xf32>
    %177 = vector.shape_cast %161 : vector<1x25xf32> to vector<1x1x25xf32>
    tpu.vector_store %arg9[%174, %c0_49, %c0_50], %177 {strides = array<i32>} : memref<8x1x25xf32, #tpu.memory_space<vmem>>, vector<1x1x25xf32>,
    %178 = vector.extract_strided_slice %173 {offsets = [0, 0], sizes = [1, 25], strides = [1, 1]} : vector<1x50xf32> to vector<1x25xf32>
    %179 = vector.extract_strided_slice %173 {offsets = [0, 25], sizes = [1, 25], strides = [1, 1]} : vector<1x50xf32> to vector<1x25xf32>
    %c3_i32 = arith.constant 3 : i32
    %180 = arith.index_cast %c3_i32 : i32 to index
    %c0_51 = arith.constant 0 : index
    %c0_52 = arith.constant 0 : index
    %181 = vector.load %arg0[%180, %c0_51, %c0_52] : memref<8x1x32xf32, #tpu.memory_space<vmem>>, vector<1x1x32xf32>
    %182 = vector.shape_cast %181 : vector<1x1x32xf32> to vector<1x32xf32>
    %183 = tpu.concatenate %182, %143 in 1 : vector<1x32xf32>, vector<1x25xf32> -> vector<1x57xf32>
    %cst_53 = arith.constant dense<0.000000e+00> : vector<1x100xf32>
    %184 = tpu.matmul %183, %0, %cst_53 {dimension_numbers = #tpu.dot_dimension_numbers<[1], [0], [0], [1], [0, 0, 1, 1], [], []>} : vector<1x57xf32>, vector<57x100xf32>, vector<1x100xf32> -> vector<1x100xf32>
    %185 = arith.addf %184, %1 : vector<1x100xf32>
    %186 = arith.negf %185 : vector<1x100xf32>
    %187 = math.exp %186 : vector<1x100xf32>
    %cst_54 = arith.constant 1.000000e+00 : f32
    %188 = vector.broadcast %cst_54 : f32 to vector<1x100xf32>
    %189 = arith.addf %188, %187 : vector<1x100xf32>
    %190 = arith.divf %188, %189 : vector<1x100xf32>
    %191 = math.tanh %185 : vector<1x100xf32>
    %192 = vector.extract_strided_slice %190 {offsets = [0, 0], sizes = [1, 25], strides = [1, 1]} : vector<1x100xf32> to vector<1x25xf32>
    %193 = vector.extract_strided_slice %190 {offsets = [0, 25], sizes = [1, 25], strides = [1, 1]} : vector<1x100xf32> to vector<1x25xf32>
    %194 = vector.extract_strided_slice %190 {offsets = [0, 75], sizes = [1, 25], strides = [1, 1]} : vector<1x100xf32> to vector<1x25xf32>
    %195 = vector.extract_strided_slice %191 {offsets = [0, 50], sizes = [1, 25], strides = [1, 1]} : vector<1x100xf32> to vector<1x25xf32>
    %196 = arith.mulf %193, %178 : vector<1x25xf32>
    %197 = arith.mulf %192, %195 : vector<1x25xf32>
    %198 = arith.addf %196, %197 : vector<1x25xf32>
    %199 = math.tanh %198 : vector<1x25xf32>
    %200 = arith.mulf %194, %199 : vector<1x25xf32>
    %201 = tpu.concatenate %200, %161 in 1 : vector<1x25xf32>, vector<1x25xf32> -> vector<1x50xf32>
    %cst_55 = arith.constant dense<0.000000e+00> : vector<1x100xf32>
    %202 = tpu.matmul %201, %2, %cst_55 {dimension_numbers = #tpu.dot_dimension_numbers<[1], [0], [0], [1], [0, 0, 1, 1], [], []>} : vector<1x50xf32>, vector<50x100xf32>, vector<1x100xf32> -> vector<1x100xf32>
    %203 = arith.addf %202, %3 : vector<1x100xf32>
    %204 = arith.negf %203 : vector<1x100xf32>
    %205 = math.exp %204 : vector<1x100xf32>
    %cst_56 = arith.constant 1.000000e+00 : f32
    %206 = vector.broadcast %cst_56 : f32 to vector<1x100xf32>
    %207 = arith.addf %206, %205 : vector<1x100xf32>
    %208 = arith.divf %206, %207 : vector<1x100xf32>
    %209 = math.tanh %203 : vector<1x100xf32>
    %210 = vector.extract_strided_slice %208 {offsets = [0, 0], sizes = [1, 25], strides = [1, 1]} : vector<1x100xf32> to vector<1x25xf32>
    %211 = vector.extract_strided_slice %208 {offsets = [0, 25], sizes = [1, 25], strides = [1, 1]} : vector<1x100xf32> to vector<1x25xf32>
    %212 = vector.extract_strided_slice %208 {offsets = [0, 75], sizes = [1, 25], strides = [1, 1]} : vector<1x100xf32> to vector<1x25xf32>
    %213 = vector.extract_strided_slice %209 {offsets = [0, 50], sizes = [1, 25], strides = [1, 1]} : vector<1x100xf32> to vector<1x25xf32>
    %214 = arith.mulf %211, %179 : vector<1x25xf32>
    %215 = arith.mulf %210, %213 : vector<1x25xf32>
    %216 = arith.addf %214, %215 : vector<1x25xf32>
    %217 = math.tanh %216 : vector<1x25xf32>
    %218 = arith.mulf %212, %217 : vector<1x25xf32>
    %219 = tpu.concatenate %198, %216 in 1 : vector<1x25xf32>, vector<1x25xf32> -> vector<1x50xf32>
    %cst_57 = arith.constant dense<0.000000e+00> : vector<1x125xf32>
    %220 = tpu.matmul %219, %4, %cst_57 {dimension_numbers = #tpu.dot_dimension_numbers<[1], [0], [0], [1], [0, 0, 1, 1], [], []>} : vector<1x50xf32>, vector<50x125xf32>, vector<1x125xf32> -> vector<1x125xf32>
    %221 = arith.addf %220, %5 : vector<1x125xf32>
    %cst_58 = arith.constant 0.000000e+00 : f32
    %222 = vector.broadcast %cst_58 : f32 to vector<1x125xf32>
    %223 = arith.maximumf %221, %222 : vector<1x125xf32>
    %cst_59 = arith.constant dense<0.000000e+00> : vector<1x50xf32>
    %224 = tpu.matmul %223, %6, %cst_59 {dimension_numbers = #tpu.dot_dimension_numbers<[1], [0], [0], [1], [0, 0, 1, 1], [], []>} : vector<1x125xf32>, vector<125x50xf32>, vector<1x50xf32> -> vector<1x50xf32>
    %225 = arith.addf %224, %7 : vector<1x50xf32>
    %226 = arith.negf %225 : vector<1x50xf32>
    %227 = math.exp %226 : vector<1x50xf32>
    %cst_60 = arith.constant 1.000000e+00 : f32
    %228 = vector.broadcast %cst_60 : f32 to vector<1x50xf32>
    %229 = arith.addf %228, %227 : vector<1x50xf32>
    %230 = arith.divf %228, %229 : vector<1x50xf32>
    %231 = arith.index_cast %c3_i32 : i32 to index
    %c0_61 = arith.constant 0 : index
    %c0_62 = arith.constant 0 : index
    %232 = vector.load %arg9[%231, %c0_61, %c0_62] : memref<8x1x25xf32, #tpu.memory_space<vmem>>, vector<1x1x25xf32>
    %233 = vector.shape_cast %232 : vector<1x1x25xf32> to vector<1x25xf32>
    %234 = vector.shape_cast %218 : vector<1x25xf32> to vector<1x1x25xf32>
    tpu.vector_store %arg9[%231, %c0_61, %c0_62], %234 {strides = array<i32>} : memref<8x1x25xf32, #tpu.memory_space<vmem>>, vector<1x1x25xf32>,
    %235 = vector.extract_strided_slice %230 {offsets = [0, 0], sizes = [1, 25], strides = [1, 1]} : vector<1x50xf32> to vector<1x25xf32>
    %236 = vector.extract_strided_slice %230 {offsets = [0, 25], sizes = [1, 25], strides = [1, 1]} : vector<1x50xf32> to vector<1x25xf32>
    %c4_i32 = arith.constant 4 : i32
    %237 = arith.index_cast %c4_i32 : i32 to index
    %c0_63 = arith.constant 0 : index
    %c0_64 = arith.constant 0 : index
    %238 = vector.load %arg0[%237, %c0_63, %c0_64] : memref<8x1x32xf32, #tpu.memory_space<vmem>>, vector<1x1x32xf32>
    %239 = vector.shape_cast %238 : vector<1x1x32xf32> to vector<1x32xf32>
    %240 = tpu.concatenate %239, %200 in 1 : vector<1x32xf32>, vector<1x25xf32> -> vector<1x57xf32>
    %cst_65 = arith.constant dense<0.000000e+00> : vector<1x100xf32>
    %241 = tpu.matmul %240, %0, %cst_65 {dimension_numbers = #tpu.dot_dimension_numbers<[1], [0], [0], [1], [0, 0, 1, 1], [], []>} : vector<1x57xf32>, vector<57x100xf32>, vector<1x100xf32> -> vector<1x100xf32>
    %242 = arith.addf %241, %1 : vector<1x100xf32>
    %243 = arith.negf %242 : vector<1x100xf32>
    %244 = math.exp %243 : vector<1x100xf32>
    %cst_66 = arith.constant 1.000000e+00 : f32
    %245 = vector.broadcast %cst_66 : f32 to vector<1x100xf32>
    %246 = arith.addf %245, %244 : vector<1x100xf32>
    %247 = arith.divf %245, %246 : vector<1x100xf32>
    %248 = math.tanh %242 : vector<1x100xf32>
    %249 = vector.extract_strided_slice %247 {offsets = [0, 0], sizes = [1, 25], strides = [1, 1]} : vector<1x100xf32> to vector<1x25xf32>
    %250 = vector.extract_strided_slice %247 {offsets = [0, 25], sizes = [1, 25], strides = [1, 1]} : vector<1x100xf32> to vector<1x25xf32>
    %251 = vector.extract_strided_slice %247 {offsets = [0, 75], sizes = [1, 25], strides = [1, 1]} : vector<1x100xf32> to vector<1x25xf32>
    %252 = vector.extract_strided_slice %248 {offsets = [0, 50], sizes = [1, 25], strides = [1, 1]} : vector<1x100xf32> to vector<1x25xf32>
    %253 = arith.mulf %250, %235 : vector<1x25xf32>
    %254 = arith.mulf %249, %252 : vector<1x25xf32>
    %255 = arith.addf %253, %254 : vector<1x25xf32>
    %256 = math.tanh %255 : vector<1x25xf32>
    %257 = arith.mulf %251, %256 : vector<1x25xf32>
    %258 = tpu.concatenate %257, %218 in 1 : vector<1x25xf32>, vector<1x25xf32> -> vector<1x50xf32>
    %cst_67 = arith.constant dense<0.000000e+00> : vector<1x100xf32>
    %259 = tpu.matmul %258, %2, %cst_67 {dimension_numbers = #tpu.dot_dimension_numbers<[1], [0], [0], [1], [0, 0, 1, 1], [], []>} : vector<1x50xf32>, vector<50x100xf32>, vector<1x100xf32> -> vector<1x100xf32>
    %260 = arith.addf %259, %3 : vector<1x100xf32>
    %261 = arith.negf %260 : vector<1x100xf32>
    %262 = math.exp %261 : vector<1x100xf32>
    %cst_68 = arith.constant 1.000000e+00 : f32
    %263 = vector.broadcast %cst_68 : f32 to vector<1x100xf32>
    %264 = arith.addf %263, %262 : vector<1x100xf32>
    %265 = arith.divf %263, %264 : vector<1x100xf32>
    %266 = math.tanh %260 : vector<1x100xf32>
    %267 = vector.extract_strided_slice %265 {offsets = [0, 0], sizes = [1, 25], strides = [1, 1]} : vector<1x100xf32> to vector<1x25xf32>
    %268 = vector.extract_strided_slice %265 {offsets = [0, 25], sizes = [1, 25], strides = [1, 1]} : vector<1x100xf32> to vector<1x25xf32>
    %269 = vector.extract_strided_slice %265 {offsets = [0, 75], sizes = [1, 25], strides = [1, 1]} : vector<1x100xf32> to vector<1x25xf32>
    %270 = vector.extract_strided_slice %266 {offsets = [0, 50], sizes = [1, 25], strides = [1, 1]} : vector<1x100xf32> to vector<1x25xf32>
    %271 = arith.mulf %268, %236 : vector<1x25xf32>
    %272 = arith.mulf %267, %270 : vector<1x25xf32>
    %273 = arith.addf %271, %272 : vector<1x25xf32>
    %274 = math.tanh %273 : vector<1x25xf32>
    %275 = arith.mulf %269, %274 : vector<1x25xf32>
    %276 = tpu.concatenate %255, %273 in 1 : vector<1x25xf32>, vector<1x25xf32> -> vector<1x50xf32>
    %cst_69 = arith.constant dense<0.000000e+00> : vector<1x125xf32>
    %277 = tpu.matmul %276, %4, %cst_69 {dimension_numbers = #tpu.dot_dimension_numbers<[1], [0], [0], [1], [0, 0, 1, 1], [], []>} : vector<1x50xf32>, vector<50x125xf32>, vector<1x125xf32> -> vector<1x125xf32>
    %278 = arith.addf %277, %5 : vector<1x125xf32>
    %cst_70 = arith.constant 0.000000e+00 : f32
    %279 = vector.broadcast %cst_70 : f32 to vector<1x125xf32>
    %280 = arith.maximumf %278, %279 : vector<1x125xf32>
    %cst_71 = arith.constant dense<0.000000e+00> : vector<1x50xf32>
    %281 = tpu.matmul %280, %6, %cst_71 {dimension_numbers = #tpu.dot_dimension_numbers<[1], [0], [0], [1], [0, 0, 1, 1], [], []>} : vector<1x125xf32>, vector<125x50xf32>, vector<1x50xf32> -> vector<1x50xf32>
    %282 = arith.addf %281, %7 : vector<1x50xf32>
    %283 = arith.negf %282 : vector<1x50xf32>
    %284 = math.exp %283 : vector<1x50xf32>
    %cst_72 = arith.constant 1.000000e+00 : f32
    %285 = vector.broadcast %cst_72 : f32 to vector<1x50xf32>
    %286 = arith.addf %285, %284 : vector<1x50xf32>
    %287 = arith.divf %285, %286 : vector<1x50xf32>
    %288 = arith.index_cast %c4_i32 : i32 to index
    %c0_73 = arith.constant 0 : index
    %c0_74 = arith.constant 0 : index
    %289 = vector.load %arg9[%288, %c0_73, %c0_74] : memref<8x1x25xf32, #tpu.memory_space<vmem>>, vector<1x1x25xf32>
    %290 = vector.shape_cast %289 : vector<1x1x25xf32> to vector<1x25xf32>
    %291 = vector.shape_cast %275 : vector<1x25xf32> to vector<1x1x25xf32>
    tpu.vector_store %arg9[%288, %c0_73, %c0_74], %291 {strides = array<i32>} : memref<8x1x25xf32, #tpu.memory_space<vmem>>, vector<1x1x25xf32>,
    %292 = vector.extract_strided_slice %287 {offsets = [0, 0], sizes = [1, 25], strides = [1, 1]} : vector<1x50xf32> to vector<1x25xf32>
    %293 = vector.extract_strided_slice %287 {offsets = [0, 25], sizes = [1, 25], strides = [1, 1]} : vector<1x50xf32> to vector<1x25xf32>
    %c5_i32 = arith.constant 5 : i32
    %294 = arith.index_cast %c5_i32 : i32 to index
    %c0_75 = arith.constant 0 : index
    %c0_76 = arith.constant 0 : index
    %295 = vector.load %arg0[%294, %c0_75, %c0_76] : memref<8x1x32xf32, #tpu.memory_space<vmem>>, vector<1x1x32xf32>
    %296 = vector.shape_cast %295 : vector<1x1x32xf32> to vector<1x32xf32>
    %297 = tpu.concatenate %296, %257 in 1 : vector<1x32xf32>, vector<1x25xf32> -> vector<1x57xf32>
    %cst_77 = arith.constant dense<0.000000e+00> : vector<1x100xf32>
    %298 = tpu.matmul %297, %0, %cst_77 {dimension_numbers = #tpu.dot_dimension_numbers<[1], [0], [0], [1], [0, 0, 1, 1], [], []>} : vector<1x57xf32>, vector<57x100xf32>, vector<1x100xf32> -> vector<1x100xf32>
    %299 = arith.addf %298, %1 : vector<1x100xf32>
    %300 = arith.negf %299 : vector<1x100xf32>
    %301 = math.exp %300 : vector<1x100xf32>
    %cst_78 = arith.constant 1.000000e+00 : f32
    %302 = vector.broadcast %cst_78 : f32 to vector<1x100xf32>
    %303 = arith.addf %302, %301 : vector<1x100xf32>
    %304 = arith.divf %302, %303 : vector<1x100xf32>
    %305 = math.tanh %299 : vector<1x100xf32>
    %306 = vector.extract_strided_slice %304 {offsets = [0, 0], sizes = [1, 25], strides = [1, 1]} : vector<1x100xf32> to vector<1x25xf32>
    %307 = vector.extract_strided_slice %304 {offsets = [0, 25], sizes = [1, 25], strides = [1, 1]} : vector<1x100xf32> to vector<1x25xf32>
    %308 = vector.extract_strided_slice %304 {offsets = [0, 75], sizes = [1, 25], strides = [1, 1]} : vector<1x100xf32> to vector<1x25xf32>
    %309 = vector.extract_strided_slice %305 {offsets = [0, 50], sizes = [1, 25], strides = [1, 1]} : vector<1x100xf32> to vector<1x25xf32>
    %310 = arith.mulf %307, %292 : vector<1x25xf32>
    %311 = arith.mulf %306, %309 : vector<1x25xf32>
    %312 = arith.addf %310, %311 : vector<1x25xf32>
    %313 = math.tanh %312 : vector<1x25xf32>
    %314 = arith.mulf %308, %313 : vector<1x25xf32>
    %315 = tpu.concatenate %314, %275 in 1 : vector<1x25xf32>, vector<1x25xf32> -> vector<1x50xf32>
    %cst_79 = arith.constant dense<0.000000e+00> : vector<1x100xf32>
    %316 = tpu.matmul %315, %2, %cst_79 {dimension_numbers = #tpu.dot_dimension_numbers<[1], [0], [0], [1], [0, 0, 1, 1], [], []>} : vector<1x50xf32>, vector<50x100xf32>, vector<1x100xf32> -> vector<1x100xf32>
    %317 = arith.addf %316, %3 : vector<1x100xf32>
    %318 = arith.negf %317 : vector<1x100xf32>
    %319 = math.exp %318 : vector<1x100xf32>
    %cst_80 = arith.constant 1.000000e+00 : f32
    %320 = vector.broadcast %cst_80 : f32 to vector<1x100xf32>
    %321 = arith.addf %320, %319 : vector<1x100xf32>
    %322 = arith.divf %320, %321 : vector<1x100xf32>
    %323 = math.tanh %317 : vector<1x100xf32>
    %324 = vector.extract_strided_slice %322 {offsets = [0, 0], sizes = [1, 25], strides = [1, 1]} : vector<1x100xf32> to vector<1x25xf32>
    %325 = vector.extract_strided_slice %322 {offsets = [0, 25], sizes = [1, 25], strides = [1, 1]} : vector<1x100xf32> to vector<1x25xf32>
    %326 = vector.extract_strided_slice %322 {offsets = [0, 75], sizes = [1, 25], strides = [1, 1]} : vector<1x100xf32> to vector<1x25xf32>
    %327 = vector.extract_strided_slice %323 {offsets = [0, 50], sizes = [1, 25], strides = [1, 1]} : vector<1x100xf32> to vector<1x25xf32>
    %328 = arith.mulf %325, %293 : vector<1x25xf32>
    %329 = arith.mulf %324, %327 : vector<1x25xf32>
    %330 = arith.addf %328, %329 : vector<1x25xf32>
    %331 = math.tanh %330 : vector<1x25xf32>
    %332 = arith.mulf %326, %331 : vector<1x25xf32>
    %333 = tpu.concatenate %312, %330 in 1 : vector<1x25xf32>, vector<1x25xf32> -> vector<1x50xf32>
    %cst_81 = arith.constant dense<0.000000e+00> : vector<1x125xf32>
    %334 = tpu.matmul %333, %4, %cst_81 {dimension_numbers = #tpu.dot_dimension_numbers<[1], [0], [0], [1], [0, 0, 1, 1], [], []>} : vector<1x50xf32>, vector<50x125xf32>, vector<1x125xf32> -> vector<1x125xf32>
    %335 = arith.addf %334, %5 : vector<1x125xf32>
    %cst_82 = arith.constant 0.000000e+00 : f32
    %336 = vector.broadcast %cst_82 : f32 to vector<1x125xf32>
    %337 = arith.maximumf %335, %336 : vector<1x125xf32>
    %cst_83 = arith.constant dense<0.000000e+00> : vector<1x50xf32>
    %338 = tpu.matmul %337, %6, %cst_83 {dimension_numbers = #tpu.dot_dimension_numbers<[1], [0], [0], [1], [0, 0, 1, 1], [], []>} : vector<1x125xf32>, vector<125x50xf32>, vector<1x50xf32> -> vector<1x50xf32>
    %339 = arith.addf %338, %7 : vector<1x50xf32>
    %340 = arith.negf %339 : vector<1x50xf32>
    %341 = math.exp %340 : vector<1x50xf32>
    %cst_84 = arith.constant 1.000000e+00 : f32
    %342 = vector.broadcast %cst_84 : f32 to vector<1x50xf32>
    %343 = arith.addf %342, %341 : vector<1x50xf32>
    %344 = arith.divf %342, %343 : vector<1x50xf32>
    %345 = arith.index_cast %c5_i32 : i32 to index
    %c0_85 = arith.constant 0 : index
    %c0_86 = arith.constant 0 : index
    %346 = vector.load %arg9[%345, %c0_85, %c0_86] : memref<8x1x25xf32, #tpu.memory_space<vmem>>, vector<1x1x25xf32>
    %347 = vector.shape_cast %346 : vector<1x1x25xf32> to vector<1x25xf32>
    %348 = vector.shape_cast %332 : vector<1x25xf32> to vector<1x1x25xf32>
    tpu.vector_store %arg9[%345, %c0_85, %c0_86], %348 {strides = array<i32>} : memref<8x1x25xf32, #tpu.memory_space<vmem>>, vector<1x1x25xf32>,
    %349 = vector.extract_strided_slice %344 {offsets = [0, 0], sizes = [1, 25], strides = [1, 1]} : vector<1x50xf32> to vector<1x25xf32>
    %350 = vector.extract_strided_slice %344 {offsets = [0, 25], sizes = [1, 25], strides = [1, 1]} : vector<1x50xf32> to vector<1x25xf32>
    %c6_i32 = arith.constant 6 : i32
    %351 = arith.index_cast %c6_i32 : i32 to index
    %c0_87 = arith.constant 0 : index
    %c0_88 = arith.constant 0 : index
    %352 = vector.load %arg0[%351, %c0_87, %c0_88] : memref<8x1x32xf32, #tpu.memory_space<vmem>>, vector<1x1x32xf32>
    %353 = vector.shape_cast %352 : vector<1x1x32xf32> to vector<1x32xf32>
    %354 = tpu.concatenate %353, %314 in 1 : vector<1x32xf32>, vector<1x25xf32> -> vector<1x57xf32>
    %cst_89 = arith.constant dense<0.000000e+00> : vector<1x100xf32>
    %355 = tpu.matmul %354, %0, %cst_89 {dimension_numbers = #tpu.dot_dimension_numbers<[1], [0], [0], [1], [0, 0, 1, 1], [], []>} : vector<1x57xf32>, vector<57x100xf32>, vector<1x100xf32> -> vector<1x100xf32>
    %356 = arith.addf %355, %1 : vector<1x100xf32>
    %357 = arith.negf %356 : vector<1x100xf32>
    %358 = math.exp %357 : vector<1x100xf32>
    %cst_90 = arith.constant 1.000000e+00 : f32
    %359 = vector.broadcast %cst_90 : f32 to vector<1x100xf32>
    %360 = arith.addf %359, %358 : vector<1x100xf32>
    %361 = arith.divf %359, %360 : vector<1x100xf32>
    %362 = math.tanh %356 : vector<1x100xf32>
    %363 = vector.extract_strided_slice %361 {offsets = [0, 0], sizes = [1, 25], strides = [1, 1]} : vector<1x100xf32> to vector<1x25xf32>
    %364 = vector.extract_strided_slice %361 {offsets = [0, 25], sizes = [1, 25], strides = [1, 1]} : vector<1x100xf32> to vector<1x25xf32>
    %365 = vector.extract_strided_slice %361 {offsets = [0, 75], sizes = [1, 25], strides = [1, 1]} : vector<1x100xf32> to vector<1x25xf32>
    %366 = vector.extract_strided_slice %362 {offsets = [0, 50], sizes = [1, 25], strides = [1, 1]} : vector<1x100xf32> to vector<1x25xf32>
    %367 = arith.mulf %364, %349 : vector<1x25xf32>
    %368 = arith.mulf %363, %366 : vector<1x25xf32>
    %369 = arith.addf %367, %368 : vector<1x25xf32>
    %370 = math.tanh %369 : vector<1x25xf32>
    %371 = arith.mulf %365, %370 : vector<1x25xf32>
    %372 = tpu.concatenate %371, %332 in 1 : vector<1x25xf32>, vector<1x25xf32> -> vector<1x50xf32>
    %cst_91 = arith.constant dense<0.000000e+00> : vector<1x100xf32>
    %373 = tpu.matmul %372, %2, %cst_91 {dimension_numbers = #tpu.dot_dimension_numbers<[1], [0], [0], [1], [0, 0, 1, 1], [], []>} : vector<1x50xf32>, vector<50x100xf32>, vector<1x100xf32> -> vector<1x100xf32>
    %374 = arith.addf %373, %3 : vector<1x100xf32>
    %375 = arith.negf %374 : vector<1x100xf32>
    %376 = math.exp %375 : vector<1x100xf32>
    %cst_92 = arith.constant 1.000000e+00 : f32
    %377 = vector.broadcast %cst_92 : f32 to vector<1x100xf32>
    %378 = arith.addf %377, %376 : vector<1x100xf32>
    %379 = arith.divf %377, %378 : vector<1x100xf32>
    %380 = math.tanh %374 : vector<1x100xf32>
    %381 = vector.extract_strided_slice %379 {offsets = [0, 0], sizes = [1, 25], strides = [1, 1]} : vector<1x100xf32> to vector<1x25xf32>
    %382 = vector.extract_strided_slice %379 {offsets = [0, 25], sizes = [1, 25], strides = [1, 1]} : vector<1x100xf32> to vector<1x25xf32>
    %383 = vector.extract_strided_slice %379 {offsets = [0, 75], sizes = [1, 25], strides = [1, 1]} : vector<1x100xf32> to vector<1x25xf32>
    %384 = vector.extract_strided_slice %380 {offsets = [0, 50], sizes = [1, 25], strides = [1, 1]} : vector<1x100xf32> to vector<1x25xf32>
    %385 = arith.mulf %382, %350 : vector<1x25xf32>
    %386 = arith.mulf %381, %384 : vector<1x25xf32>
    %387 = arith.addf %385, %386 : vector<1x25xf32>
    %388 = math.tanh %387 : vector<1x25xf32>
    %389 = arith.mulf %383, %388 : vector<1x25xf32>
    %390 = tpu.concatenate %369, %387 in 1 : vector<1x25xf32>, vector<1x25xf32> -> vector<1x50xf32>
    %cst_93 = arith.constant dense<0.000000e+00> : vector<1x125xf32>
    %391 = tpu.matmul %390, %4, %cst_93 {dimension_numbers = #tpu.dot_dimension_numbers<[1], [0], [0], [1], [0, 0, 1, 1], [], []>} : vector<1x50xf32>, vector<50x125xf32>, vector<1x125xf32> -> vector<1x125xf32>
    %392 = arith.addf %391, %5 : vector<1x125xf32>
    %cst_94 = arith.constant 0.000000e+00 : f32
    %393 = vector.broadcast %cst_94 : f32 to vector<1x125xf32>
    %394 = arith.maximumf %392, %393 : vector<1x125xf32>
    %cst_95 = arith.constant dense<0.000000e+00> : vector<1x50xf32>
    %395 = tpu.matmul %394, %6, %cst_95 {dimension_numbers = #tpu.dot_dimension_numbers<[1], [0], [0], [1], [0, 0, 1, 1], [], []>} : vector<1x125xf32>, vector<125x50xf32>, vector<1x50xf32> -> vector<1x50xf32>
    %396 = arith.addf %395, %7 : vector<1x50xf32>
    %397 = arith.negf %396 : vector<1x50xf32>
    %398 = math.exp %397 : vector<1x50xf32>
    %cst_96 = arith.constant 1.000000e+00 : f32
    %399 = vector.broadcast %cst_96 : f32 to vector<1x50xf32>
    %400 = arith.addf %399, %398 : vector<1x50xf32>
    %401 = arith.divf %399, %400 : vector<1x50xf32>
    %402 = arith.index_cast %c6_i32 : i32 to index
    %c0_97 = arith.constant 0 : index
    %c0_98 = arith.constant 0 : index
    %403 = vector.load %arg9[%402, %c0_97, %c0_98] : memref<8x1x25xf32, #tpu.memory_space<vmem>>, vector<1x1x25xf32>
    %404 = vector.shape_cast %403 : vector<1x1x25xf32> to vector<1x25xf32>
    %405 = vector.shape_cast %389 : vector<1x25xf32> to vector<1x1x25xf32>
    tpu.vector_store %arg9[%402, %c0_97, %c0_98], %405 {strides = array<i32>} : memref<8x1x25xf32, #tpu.memory_space<vmem>>, vector<1x1x25xf32>,
    %406 = vector.extract_strided_slice %401 {offsets = [0, 0], sizes = [1, 25], strides = [1, 1]} : vector<1x50xf32> to vector<1x25xf32>
    %407 = vector.extract_strided_slice %401 {offsets = [0, 25], sizes = [1, 25], strides = [1, 1]} : vector<1x50xf32> to vector<1x25xf32>
    %c7_i32 = arith.constant 7 : i32
    %408 = arith.index_cast %c7_i32 : i32 to index
    %c0_99 = arith.constant 0 : index
    %c0_100 = arith.constant 0 : index
    %409 = vector.load %arg0[%408, %c0_99, %c0_100] : memref<8x1x32xf32, #tpu.memory_space<vmem>>, vector<1x1x32xf32>
    %410 = vector.shape_cast %409 : vector<1x1x32xf32> to vector<1x32xf32>
    %411 = tpu.concatenate %410, %371 in 1 : vector<1x32xf32>, vector<1x25xf32> -> vector<1x57xf32>
    %cst_101 = arith.constant dense<0.000000e+00> : vector<1x100xf32>
    %412 = tpu.matmul %411, %0, %cst_101 {dimension_numbers = #tpu.dot_dimension_numbers<[1], [0], [0], [1], [0, 0, 1, 1], [], []>} : vector<1x57xf32>, vector<57x100xf32>, vector<1x100xf32> -> vector<1x100xf32>
    %413 = arith.addf %412, %1 : vector<1x100xf32>
    %414 = arith.negf %413 : vector<1x100xf32>
    %415 = math.exp %414 : vector<1x100xf32>
    %cst_102 = arith.constant 1.000000e+00 : f32
    %416 = vector.broadcast %cst_102 : f32 to vector<1x100xf32>
    %417 = arith.addf %416, %415 : vector<1x100xf32>
    %418 = arith.divf %416, %417 : vector<1x100xf32>
    %419 = math.tanh %413 : vector<1x100xf32>
    %420 = vector.extract_strided_slice %418 {offsets = [0, 0], sizes = [1, 25], strides = [1, 1]} : vector<1x100xf32> to vector<1x25xf32>
    %421 = vector.extract_strided_slice %418 {offsets = [0, 25], sizes = [1, 25], strides = [1, 1]} : vector<1x100xf32> to vector<1x25xf32>
    %422 = vector.extract_strided_slice %418 {offsets = [0, 75], sizes = [1, 25], strides = [1, 1]} : vector<1x100xf32> to vector<1x25xf32>
    %423 = vector.extract_strided_slice %419 {offsets = [0, 50], sizes = [1, 25], strides = [1, 1]} : vector<1x100xf32> to vector<1x25xf32>
    %424 = arith.mulf %421, %406 : vector<1x25xf32>
    %425 = arith.mulf %420, %423 : vector<1x25xf32>
    %426 = arith.addf %424, %425 : vector<1x25xf32>
    %427 = math.tanh %426 : vector<1x25xf32>
    %428 = arith.mulf %422, %427 : vector<1x25xf32>
    %429 = tpu.concatenate %428, %389 in 1 : vector<1x25xf32>, vector<1x25xf32> -> vector<1x50xf32>
    %cst_103 = arith.constant dense<0.000000e+00> : vector<1x100xf32>
    %430 = tpu.matmul %429, %2, %cst_103 {dimension_numbers = #tpu.dot_dimension_numbers<[1], [0], [0], [1], [0, 0, 1, 1], [], []>} : vector<1x50xf32>, vector<50x100xf32>, vector<1x100xf32> -> vector<1x100xf32>
    %431 = arith.addf %430, %3 : vector<1x100xf32>
    %432 = arith.negf %431 : vector<1x100xf32>
    %433 = math.exp %432 : vector<1x100xf32>
    %cst_104 = arith.constant 1.000000e+00 : f32
    %434 = vector.broadcast %cst_104 : f32 to vector<1x100xf32>
    %435 = arith.addf %434, %433 : vector<1x100xf32>
    %436 = arith.divf %434, %435 : vector<1x100xf32>
    %437 = math.tanh %431 : vector<1x100xf32>
    %438 = vector.extract_strided_slice %436 {offsets = [0, 0], sizes = [1, 25], strides = [1, 1]} : vector<1x100xf32> to vector<1x25xf32>
    %439 = vector.extract_strided_slice %436 {offsets = [0, 25], sizes = [1, 25], strides = [1, 1]} : vector<1x100xf32> to vector<1x25xf32>
    %440 = vector.extract_strided_slice %436 {offsets = [0, 75], sizes = [1, 25], strides = [1, 1]} : vector<1x100xf32> to vector<1x25xf32>
    %441 = vector.extract_strided_slice %437 {offsets = [0, 50], sizes = [1, 25], strides = [1, 1]} : vector<1x100xf32> to vector<1x25xf32>
    %442 = arith.mulf %439, %407 : vector<1x25xf32>
    %443 = arith.mulf %438, %441 : vector<1x25xf32>
    %444 = arith.addf %442, %443 : vector<1x25xf32>
    %445 = math.tanh %444 : vector<1x25xf32>
    %446 = arith.mulf %440, %445 : vector<1x25xf32>
    %447 = tpu.concatenate %426, %444 in 1 : vector<1x25xf32>, vector<1x25xf32> -> vector<1x50xf32>
    %cst_105 = arith.constant dense<0.000000e+00> : vector<1x125xf32>
    %448 = tpu.matmul %447, %4, %cst_105 {dimension_numbers = #tpu.dot_dimension_numbers<[1], [0], [0], [1], [0, 0, 1, 1], [], []>} : vector<1x50xf32>, vector<50x125xf32>, vector<1x125xf32> -> vector<1x125xf32>
    %449 = arith.addf %448, %5 : vector<1x125xf32>
    %cst_106 = arith.constant 0.000000e+00 : f32
    %450 = vector.broadcast %cst_106 : f32 to vector<1x125xf32>
    %451 = arith.maximumf %449, %450 : vector<1x125xf32>
    %cst_107 = arith.constant dense<0.000000e+00> : vector<1x50xf32>
    %452 = tpu.matmul %451, %6, %cst_107 {dimension_numbers = #tpu.dot_dimension_numbers<[1], [0], [0], [1], [0, 0, 1, 1], [], []>} : vector<1x125xf32>, vector<125x50xf32>, vector<1x50xf32> -> vector<1x50xf32>
    %453 = arith.addf %452, %7 : vector<1x50xf32>
    %454 = arith.negf %453 : vector<1x50xf32>
    %455 = math.exp %454 : vector<1x50xf32>
    %cst_108 = arith.constant 1.000000e+00 : f32
    %456 = vector.broadcast %cst_108 : f32 to vector<1x50xf32>
    %457 = arith.addf %456, %455 : vector<1x50xf32>
    %458 = arith.divf %456, %457 : vector<1x50xf32>
    %459 = arith.index_cast %c7_i32 : i32 to index
    %c0_109 = arith.constant 0 : index
    %c0_110 = arith.constant 0 : index
    %460 = vector.load %arg9[%459, %c0_109, %c0_110] : memref<8x1x25xf32, #tpu.memory_space<vmem>>, vector<1x1x25xf32>
    %461 = vector.shape_cast %460 : vector<1x1x25xf32> to vector<1x25xf32>
    %462 = vector.shape_cast %446 : vector<1x25xf32> to vector<1x1x25xf32>
    tpu.vector_store %arg9[%459, %c0_109, %c0_110], %462 {strides = array<i32>} : memref<8x1x25xf32, #tpu.memory_space<vmem>>, vector<1x1x25xf32>,
    %463 = vector.extract_strided_slice %458 {offsets = [0, 0], sizes = [1, 25], strides = [1, 1]} : vector<1x50xf32> to vector<1x25xf32>
    %464 = vector.extract_strided_slice %458 {offsets = [0, 25], sizes = [1, 25], strides = [1, 1]} : vector<1x50xf32> to vector<1x25xf32>
    %c8_i32 = arith.constant 8 : i32
    return
  }
}

</mosaic_0001>

<bundles_post_ra>
// kernel: lstm_cnn_forward.1
= control target key start
LH: loop header
LB: loop body
LE: loop exit
PB: predicated region body
PF: predicated region fallthrough
CT: control target
= control target key end

     0   :  { %14 = vsyncpa [#allocation3], 0  ;;  %s2081_s12 = smov [#allocation2]   ;;  %s3071_s0 = inlined_call_operand.vmem [shape: f32[8,1,32], index: 0, kind: input, shape index: {}]   ;;  %s3072_s1 = inlined_call_operand.vmem [shape: f32[57,100], index: 1, kind: input, shape index: {}]   ;;  %s3073_s2 = inlined_call_operand.vmem [shape: f32[1,100], index: 2, kind: input, shape index: {}]   ;;  %s3074_s3 = inlined_call_operand.vmem [shape: f32[50,100], index: 3, kind: input, shape index: {}]   ;;  %s3075_s4 = inlined_call_operand.hbm [shape: f32[1,100], index: 4, kind: input, shape index: {}]   ;;  %s3076_s5 = inlined_call_operand.vmem [shape: f32[50,125], index: 5, kind: input, shape index: {}]   ;;  %s3077_s6 = inlined_call_operand.vmem [shape: f32[1,125], index: 6, kind: input, shape index: {}]   ;;  %s3078_s7 = inlined_call_operand.vmem [shape: f32[125,50], index: 7, kind: input, shape index: {}]   ;;  %s3079_s8 = inlined_call_operand.vmem [shape: f32[1,50], index: 8, kind: input, shape index: {}]   ;;  %s3080_s9 = inlined_call_operand.vmem [shape: f32[8,1,25], index: 9, kind: output, shape index: {}]  }
   0x1   :  { %s28_s11 = sshll.u32 %s3075_s4, 4  ;;  %s30_s13 = sshll.u32 %s2081_s12, 4  ;;  %s29_s11 = int_to_ptr.hbm [resolvable:$true] %s28_s11  ;;  %s31_s13 = int_to_ptr.vmem [resolvable:$true] %s30_s13 }
   0x2   :  { %33 = dma.hbm_to_vmem [thread:$0]  %s29_s11, 16, %s31_s13, [#allocation3]  }
   0x3   :  { %2079 = dma.done.wait [#allocation3], 16  }
   0x4   :  { %2080 = vsyncadd [#allocation3], 4294967280  ;;  %vm95_vm0 = vcmask 1040384   ;;  %v2144_v0 = vld [vmem:[%s3072_s1 + $0x38] sm:$0x1]  ;;  %v2149_v1 = vld [vmem:[%s3072_s1 + $0x30] sm:$0xff] }
   0x5   :  { %1751 = vmatpush.msk.msra.mxu0 %vm95_vm0, %v2144_v0  ;;  %v2156_v2 = vld [vmem:[%s3072_s1 + $0x28] sm:$0xff]  ;;  %v2162_v3 = vld [vmem:[%s3072_s1 + $0x20] sm:$0xff]  ;;  %v2168_v4 = vld [vmem:[%s3072_s1 + $0x18] sm:$0xff]  ;;  %vm89_vm1 = vcmask 261120   ;;  %vm91_vm2 = vcmask 465920   ;;  %s2082_s12 = smov 78  }
   0x6   :  { %v2174_v5 = vld [vmem:[%s3072_s1 + $0x10] sm:$0xff]  ;;  %v2180_v6 = vld [vmem:[%s3072_s1 + $0x8] sm:$0xff]  ;;  %v88_v7 = vld [vmem:[%s3071_s0] sm:$0x1]  ;;  %s2083_s13 = smov 25   ;;  %s2084_s14 = smov 103  }
   0x7   :  { %108 = vmatpush.msra.mxu0 %v2149_v1  ;;  %v2189_v8 = vld [vmem:[%s3072_s1] sm:$0xff]  ;;  %v90_v9 = vsel %vm89_vm1, %v88_v7, 0.0  ;;  %s2085_s15 = smov 50   ;;  %v2208_v33 = vld [vmem:[%s3074_s3 + $0x30] sm:$0x3]  ;;  %vm166_vm7 = vcmask 1041408  }
   0x8   :  { %v2198_v10 = vld [vmem:[%s3073_s2] sm:$0x1]  ;;  %v2213_v34 = vld [vmem:[%s3074_s3 + $0x28] sm:$0xff]  ;;  %1754 = vmatpush.msk.msra.mxu1 %vm166_vm7, %v2208_v33  ;;  %1766 = vmatpush.msk.msra.mxu2 %vm166_vm7, %v2208_v33  ;;  %v2229_v36 = vld [vmem:[%s3074_s3 + $0x18] sm:$0xff]  ;;  %s2086_s27 = smov 53   ;;  %s2087_s28 = smov 85  }
   0x9   :  { %109 = vmatpush.msra.mxu0 %v2156_v2  ;;  %v2222_v35 = vld [vmem:[%s3074_s3 + $0x20] sm:$0xff]  ;;  %v2236_v37 = vld [vmem:[%s3074_s3 + $0x10] sm:$0xff]  ;;  %v2243_v38 = vld [vmem:[%s3074_s3 + $0x8] sm:$0xff]  ;;  %vm160_vm8 = vcmask 203776   ;;  %vm162_vm9 = vcmask 408576   ;;  %vm263_vm14 = vcmask 1044480  }
   0xa   :  { %180 = vmatpush.msra.mxu1 %v2213_v34  ;;  %403 = vmatpush.msra.mxu2 %v2213_v34  ;;  %v2254_v41 = vld [vmem:[%s3074_s3] sm:$0xff]  ;;  %v2267_v51 = vld [vmem:[%s3076_s5 + $0x30] sm:$0x3]  ;;  %v2272_v52 = vld [vmem:[%s3076_s5 + $0x28] sm:$0xff]  ;;  %vm259_vm15 = vcmask 1022976  }
   0xb   :  { %110 = vmatpush.msra.mxu0 %v2162_v3  ;;  %v2260_v44 = vld [vmem:[#allocation2] sm:$0x1]  ;;  %v2288_v54 = vld [vmem:[%s3076_s5 + $0x18] sm:$0xff]  ;;  %v2295_v55 = vld [vmem:[%s3076_s5 + $0x10] sm:$0xff] }
   0xc   :  { %181 = vmatpush.msra.mxu1 %v2222_v35  ;;  %404 = vmatpush.msra.mxu2 %v2222_v35  ;;  %v2281_v53 = vld [vmem:[%s3076_s5 + $0x20] sm:$0xff]  ;;  %v2302_v57 = vld [vmem:[%s3076_s5 + $0x8] sm:$0xff] }
   0xd   :  { %111 = vmatpush.msra.mxu0 %v2168_v4  ;;  %v2309_v59 = vld [vmem:[%s3076_s5] sm:$0xff] }
   0xe   :  { %182 = vmatpush.msra.mxu1 %v2229_v36  ;;  %405 = vmatpush.msra.mxu2 %v2229_v36 }
   0xf   :  { %112 = vmatpush.msra.mxu0 %v2174_v5 }
  0x10   :  { %183 = vmatpush.msra.mxu1 %v2236_v37  ;;  %406 = vmatpush.msra.mxu2 %v2236_v37 }
  0x11   :  { %113 = vmatpush.msra.mxu0 %v2180_v6 }
  0x12   :  { %184 = vmatpush.msra.mxu1 %v2243_v38  ;;  %407 = vmatpush.msra.mxu2 %v2243_v38 }
  0x13   :  { %114 = vmatpush.msra.mxu0 %v2189_v8 }
  0x14   :  { %1752 = vmatmul.msk.f32.vlgmr.msra.gmra.mxu0 %vm91_vm2, %v90_v9  ;;  %185 = vmatpush.msra.mxu1 %v2254_v41 }
  0x15   :  { %408 = vmatpush.msra.mxu2 %v2254_v41  ;;  %1769 = vmatpush.msk.msrb.mxu0 %vm166_vm7, %v2267_v51 }
  0x16   :  { %1757 = vmatpush.msk.msrb.mxu1 %vm166_vm7, %v2267_v51 }
  0x17   :  { %468 = vmatpush.msrb.mxu0 %v2272_v52 }
  0x18   :  { %248 = vmatpush.msrb.mxu1 %v2272_v52 }
  0x19   :  { %469 = vmatpush.msrb.mxu0 %v2281_v53 }
  0x1a   :  { %249 = vmatpush.msrb.mxu1 %v2281_v53 }
  0x1b   :  { %470 = vmatpush.msrb.mxu0 %v2288_v54 }
  0x1c   :  { %250 = vmatpush.msrb.mxu1 %v2288_v54 }
  0x1d   :  { %471 = vmatpush.msrb.mxu0 %v2295_v55 }
  0x1e   :  { %251 = vmatpush.msrb.mxu1 %v2295_v55 }
  0x1f   :  { %472 = vmatpush.msrb.mxu0 %v2302_v57 }
  0x20   :  { %252 = vmatpush.msrb.mxu1 %v2302_v57 }
  0x21   :  { %473 = vmatpush.msrb.mxu0 %v2309_v59 }
  0x22   :  { %253 = vmatpush.msrb.mxu1 %v2309_v59 }
  0x23   :  { %1776 = vmatpush.msk.msra.mxu0 %vm95_vm0, %v2144_v0 }
  0x25   :  { %545 = vmatpush.msra.mxu0 %v2149_v1 }
  0x27   :  { %546 = vmatpush.msra.mxu0 %v2156_v2 }
  0x29   :  { %547 = vmatpush.msra.mxu0 %v2162_v3 }
  0x2b   :  { %548 = vmatpush.msra.mxu0 %v2168_v4 }
  0x2d   :  { %549 = vmatpush.msra.mxu0 %v2174_v5 }
  0x2f   :  { %550 = vmatpush.msra.mxu0 %v2180_v6 }
  0x31   :  { %551 = vmatpush.msra.mxu0 %v2189_v8 }
  0x91   :  { %v116_v11 = vpop.f32.mrf.mxu0 }
  0x92   :  { %v117_v12 = vadd.f32 %v116_v11, %v2198_v10 }
  0x94   :  { %1855 = vtanh.f32 %v117_v12  ;;  %v1753_v14 = vmul.f32 -1.442695, %v117_v12 }
  0x96   :  { %1857 = vpow2.f32 %v1753_v14 }
  0x9a   :  { %v1856_v13 = vpop.eup %1855 }
  0x9b   :  { %141 = vrot.lane.b32.xlu0 %v1856_v13, %s2082_s12 }
  0x9c   :  { %v1858_v15 = vpop.eup %1857 }
  0x9d   :  { %v122_v16 = vadd.f32 1.0, %v1858_v15  ;;  %v2340_v15 = vld [vmem:[%s3078_s7 + $0x78] sm:$0x1f] }
  0x9e   :  { %1759 = vmatpush.msk.msra.mxu3 %vm263_vm14, %v2340_v15  ;;  %1771 = vmatpush.msk.msrb.mxu2 %vm263_vm14, %v2340_v15 }
  0x9f   :  { %1859 = vrcp.f32 %v122_v16  ;;  %v134_v22 = vand.u32 2147483648, %v122_v16  ;;  %vm128_vm4 = vweird.f32 %v122_v16  ;;  %v132_v23 = vand.u32 2147483647, %v122_v16 }
  0xa1   :  { %v135_v25 = vor.u32 1.1754944e-38, %v134_v22  ;;  %vm133_vm6 = vcmp.eq.f32.partialorder %v132_v23, 8.507059e+37  ;;  %v2389_v22 = vld [vmem:[%s3078_s7 + $0x40] sm:$0xff]  ;;  %v2396_v23 = vld [vmem:[%s3078_s7 + $0x38] sm:$0xff] }
  0xa5   :  { %v1860_v17 = vpop.eup %1859 }
  0xa6   :  { %v124_v18 = vmul.f32 %v1860_v17, %v122_v16  ;;  %vm129_vm3 = vweird.f32 %v1860_v17  ;;  %v2345_v16 = vld [vmem:[%s3078_s7 + $0x70] sm:$0xff] }
  0xa7   :  { %vm130_vm5 = vmor %vm128_vm4, %vm129_vm3  ;;  %268 = vmatpush.msra.mxu3 %v2345_v16  ;;  %483 = vmatpush.msrb.mxu2 %v2345_v16 }
  0xa8   :  { %v125_v19 = vsub.f32 1.0, %v124_v18  ;;  %v2361_v18 = vld [vmem:[%s3078_s7 + $0x60] sm:$0xff] }
  0xaa   :  { %v126_v20 = vmul.f32 %v1860_v17, %v125_v19  ;;  %v2368_v19 = vld [vmem:[%s3078_s7 + $0x58] sm:$0xff] }
  0xac   :  { %v127_v21 = vadd.f32 %v1860_v17, %v126_v20  ;;  %v2375_v20 = vld [vmem:[%s3078_s7 + $0x50] sm:$0xff] }
  0xae   :  { %v131_v24 = vsel %vm130_vm5, %v1860_v17, %v127_v21  ;;  %v2354_v17 = vld [vmem:[%s3078_s7 + $0x68] sm:$0xff] }
  0xaf   :  { %v136_v27 = vsel %vm133_vm6, %v135_v25, %v131_v24  ;;  %269 = vmatpush.msra.mxu3 %v2354_v17  ;;  %484 = vmatpush.msrb.mxu2 %v2354_v17  ;;  %v2382_v21 = vld [vmem:[%s3078_s7 + $0x48] sm:$0xff]  ;;  %v2403_v24 = vld [vmem:[%s3078_s7 + $0x30] sm:$0xff] }
  0xb0   :  { %v139_v29 = vmul.f32 0.0, %v136_v27  ;;  %v2410_v25 = vld [vmem:[%s3078_s7 + $0x28] sm:$0xff] }
  0xb1   :  { %270 = vmatpush.msra.mxu3 %v2361_v18  ;;  %485 = vmatpush.msrb.mxu2 %v2361_v18 }
  0xb3   :  { %271 = vmatpush.msra.mxu3 %v2368_v19  ;;  %486 = vmatpush.msrb.mxu2 %v2368_v19 }
  0xb5   :  { %272 = vmatpush.msra.mxu3 %v2375_v20  ;;  %487 = vmatpush.msrb.mxu2 %v2375_v20 }
  0xb7   :  { %273 = vmatpush.msra.mxu3 %v2382_v21  ;;  %488 = vmatpush.msrb.mxu2 %v2382_v21 }
  0xb9   :  { %274 = vmatpush.msra.mxu3 %v2389_v22  ;;  %489 = vmatpush.msrb.mxu2 %v2389_v22 }
  0xbb   :  { %275 = vmatpush.msra.mxu3 %v2396_v23  ;;  %490 = vmatpush.msrb.mxu2 %v2396_v23 }
  0xbd   :  { %276 = vmatpush.msra.mxu3 %v2403_v24  ;;  %491 = vmatpush.msrb.mxu2 %v2403_v24 }
  0xbf   :  { %277 = vmatpush.msra.mxu3 %v2410_v25  ;;  %492 = vmatpush.msrb.mxu2 %v2410_v25 }
 0x10d   :  { %v142_v26 = vpop.permute.xlu0 %141 }
 0x10e   :  { %v144_v28 = vmul.f32 %v142_v26, %v136_v27 }
 0x110   :  { %146 = vrot.lane.b32.xlu0 %v144_v28, %s2083_s13  ;;  %v2418_v28 = vld [vmem:[%s3078_s7 + $0x20] sm:$0xff] }
 0x111   :  { %278 = vmatpush.msra.mxu3 %v2418_v28  ;;  %493 = vmatpush.msrb.mxu2 %v2418_v28 }
 0x182   :  { %v147_v30 = vpop.permute.xlu0 %146 }
 0x183   :  { %v149_v31 = vadd.f32 %v147_v30, %v139_v29 }
 0x185   :  { %1861 = vtanh.f32 %v149_v31  ;;  %228 = vrot.lane.b32.xlu0 %v149_v31, %s2084_s14  ;;  %v2427_v31 = vld [vmem:[%s3078_s7 + $0x18] sm:$0xff] }
 0x186   :  { %279 = vmatpush.msra.mxu3 %v2427_v31  ;;  %494 = vmatpush.msrb.mxu2 %v2427_v31 }
 0x18b   :  { %v1862_v32 = vpop.eup %1861 }
 0x18c   :  { %152 = vrot.lane.b32.xlu1 %v1862_v32, %s2085_s15 }
 0x1f7   :  { %v229_v30 = vpop.permute.xlu0 %228 }
 0x1fe   :  { %v153_v39 = vpop.permute.xlu1 %152 }
 0x1ff   :  { %v155_v40 = vmul.f32 %v153_v39, %v136_v27  ;;  %v1762_v39 = vld [vmem:[%s3071_s0 + $0x1] sm:$0x1] }
 0x201   :  { %157 = vrot.lane.b32.xlu1 %v155_v40, %s2086_s27 }
 0x209   :  { %314 = vrot.lane.b32.xlu1 %v155_v40, %s2087_s28 }
 0x273   :  { %v158_v42 = vpop.permute.xlu1 %157 }
 0x274   :  { %v161_v43 = vsel %vm160_vm8, %v158_v42, 0.0 }
 0x275   :  { %1755 = vmatmul.msk.f32.vlgmr.msra.gmra.mxu1 %vm162_vm9, %v161_v43  ;;  %v2466_v43 = vld [vmem:[%s3078_s7 + $0x10] sm:$0xff] }
 0x276   :  { %1763 = vmatpush.msk.msra.mxu1 %vm95_vm0, %v2144_v0  ;;  %280 = vmatpush.msra.mxu3 %v2466_v43 }
 0x277   :  { %495 = vmatpush.msrb.mxu2 %v2466_v43 }
 0x278   :  { %330 = vmatpush.msra.mxu1 %v2149_v1 }
 0x27a   :  { %331 = vmatpush.msra.mxu1 %v2156_v2 }
 0x27b   :  { %v315_v40 = vpop.permute.xlu1 %314 }
 0x27c   :  { %332 = vmatpush.msra.mxu1 %v2162_v3  ;;  %v317_v42 = vsel %vm89_vm1, %v1762_v39, %v315_v40 }
 0x27e   :  { %333 = vmatpush.msra.mxu1 %v2168_v4 }
 0x280   :  { %334 = vmatpush.msra.mxu1 %v2174_v5 }
 0x282   :  { %335 = vmatpush.msra.mxu1 %v2180_v6 }
 0x284   :  { %336 = vmatpush.msra.mxu1 %v2189_v8 }
 0x2f2   :  { %v187_v45 = vpop.f32.mrf.mxu1 }
 0x2f3   :  { %v188_v46 = vadd.f32 %v187_v45, %v2260_v44  ;;  %v2473_v45 = vld [vmem:[%s3078_s7 + $0x8] sm:$0xff] }
 0x2f4   :  { %281 = vmatpush.msra.mxu3 %v2473_v45  ;;  %496 = vmatpush.msrb.mxu2 %v2473_v45 }
 0x2f5   :  { %1863 = vtanh.f32 %v188_v46  ;;  %v1756_v48 = vmul.f32 -1.442695, %v188_v46  ;;  %v2481_v46 = vld [vmem:[%s3078_s7] sm:$0xff] }
 0x2f6   :  { %282 = vmatpush.msra.mxu3 %v2481_v46  ;;  %497 = vmatpush.msrb.mxu2 %v2481_v46 }
 0x2f7   :  { %1865 = vpow2.f32 %v1756_v48 }
 0x2f8   :  { %1782 = vmatpush.msk.msrb.mxu3 %vm166_vm7, %v2267_v51 }
 0x2fa   :  { %683 = vmatpush.msrb.mxu3 %v2272_v52 }
 0x2fb   :  { %v1864_v47 = vpop.eup %1863 }
 0x2fc   :  { %212 = vrot.lane.b32.xlu2 %v1864_v47, %s2082_s12  ;;  %684 = vmatpush.msrb.mxu3 %v2281_v53  ;;  %v2498_v47 = vld [vmem:[%s3077_s6] sm:$0x1] }
 0x2fd   :  { %v1866_v49 = vpop.eup %1865 }
 0x2fe   :  { %v193_v50 = vadd.f32 1.0, %v1866_v49  ;;  %685 = vmatpush.msrb.mxu3 %v2288_v54 }
 0x300   :  { %1867 = vrcp.f32 %v193_v50  ;;  %v205_v63 = vand.u32 2147483648, %v193_v50  ;;  %vm199_vm11 = vweird.f32 %v193_v50  ;;  %v203_v7 = vand.u32 2147483647, %v193_v50  ;;  %686 = vmatpush.msrb.mxu3 %v2295_v55 }
 0x302   :  { %v206_v11 = vor.u32 1.1754944e-38, %v205_v63  ;;  %vm204_vm13 = vcmp.eq.f32.partialorder %v203_v7, 8.507059e+37  ;;  %687 = vmatpush.msrb.mxu3 %v2302_v57 }
 0x304   :  { %688 = vmatpush.msrb.mxu3 %v2309_v59 }
 0x306   :  { %v1868_v56 = vpop.eup %1867 }
 0x307   :  { %v195_v58 = vmul.f32 %v1868_v56, %v193_v50  ;;  %vm200_vm10 = vweird.f32 %v1868_v56 }
 0x308   :  { %vm201_vm12 = vmor %vm199_vm11, %vm200_vm10 }
 0x309   :  { %v196_v60 = vsub.f32 1.0, %v195_v58 }
 0x30b   :  { %v197_v61 = vmul.f32 %v1868_v56, %v196_v60 }
 0x30d   :  { %v198_v62 = vadd.f32 %v1868_v56, %v197_v61 }
 0x30f   :  { %v202_v9 = vsel %vm201_vm12, %v1868_v56, %v198_v62 }
 0x310   :  { %v2333_v13 = vsel %vm204_vm13, %v206_v11, %v202_v9 }
 0x311   :  { %v210_v26 = vmul.f32 0.0, %v2333_v13 }
 0x356   :  { %v213_v12 = vpop.permute.xlu2 %212 }
 0x357   :  { %v215_v14 = vmul.f32 %v213_v12, %v2333_v13 }
 0x359   :  { %217 = vrot.lane.b32.xlu2 %v215_v14, %s2083_s13 }
 0x3b3   :  { %v218_v27 = vpop.permute.xlu2 %217 }
 0x3b4   :  { %v2420_v29 = vadd.f32 %v218_v27, %v210_v26 }
 0x3b6   :  { %v231_v32 = vsel %vm160_vm8, %v229_v30, %v2420_v29 }
 0x3b7   :  { %1758 = vmatmul.msk.f32.vlgmr.msrb.gmra.mxu1 %vm162_vm9, %v231_v32 }
 0x3b8   :  { %1779 = vmatpush.msk.msrb.mxu1 %vm166_vm7, %v2208_v33 }
 0x3ba   :  { %618 = vmatpush.msrb.mxu1 %v2213_v34 }
 0x3bc   :  { %619 = vmatpush.msrb.mxu1 %v2222_v35 }
 0x3be   :  { %620 = vmatpush.msrb.mxu1 %v2229_v36 }
 0x3bf   :  { %1764 = vmatmul.msk.f32.vlgmr.msra.gmra.mxu1 %vm91_vm2, %v317_v42 }
 0x3c0   :  { %621 = vmatpush.msrb.mxu1 %v2236_v37 }
 0x3c2   :  { %622 = vmatpush.msrb.mxu1 %v2243_v38 }
 0x3c4   :  { %623 = vmatpush.msrb.mxu1 %v2254_v41 }
 0x3c6   :  { %1784 = vmatpush.msk.msra.mxu1 %vm263_vm14, %v2340_v15 }
 0x3c8   :  { %698 = vmatpush.msra.mxu1 %v2345_v16 }
 0x3ca   :  { %699 = vmatpush.msra.mxu1 %v2354_v17 }
 0x3cc   :  { %700 = vmatpush.msra.mxu1 %v2361_v18 }
 0x3ce   :  { %701 = vmatpush.msra.mxu1 %v2368_v19 }
 0x3d0   :  { %702 = vmatpush.msra.mxu1 %v2375_v20 }
 0x3d2   :  { %703 = vmatpush.msra.mxu1 %v2382_v21 }
 0x3d4   :  { %704 = vmatpush.msra.mxu1 %v2389_v22 }
 0x3d6   :  { %705 = vmatpush.msra.mxu1 %v2396_v23 }
 0x3d8   :  { %706 = vmatpush.msra.mxu1 %v2403_v24 }
 0x3da   :  { %707 = vmatpush.msra.mxu1 %v2410_v25 }
 0x3dc   :  { %708 = vmatpush.msra.mxu1 %v2418_v28 }
 0x3de   :  { %709 = vmatpush.msra.mxu1 %v2427_v31 }
 0x3e0   :  { %710 = vmatpush.msra.mxu1 %v2466_v43 }
 0x3e2   :  { %711 = vmatpush.msra.mxu1 %v2473_v45 }
 0x3e4   :  { %712 = vmatpush.msra.mxu1 %v2481_v46 }
 0x434   :  { %v255_v48 = vpop.f32.mrf.mxu1 }
 0x435   :  { %v256_v49 = vadd.f32 %v255_v48, %v2498_v47 }
 0x437   :  { %v258_v50 = vmax.f32 %v256_v49, 0.0 }
 0x439   :  { %1760 = vmatmul.msk.f32.vlgmr.msra.gmra.mxu3 %vm259_vm15, %v258_v50  ;;  %v2523_v50 = vld [vmem:[%s3079_s8] sm:$0x1] }
 0x43a   :  { %1792 = vmatpush.msk.msra.mxu3 %vm166_vm7, %v2208_v33 }
 0x43c   :  { %v338_v56 = vpop.f32.mrf.mxu1  ;;  %833 = vmatpush.msra.mxu3 %v2213_v34 }
 0x43d   :  { %v339_v58 = vadd.f32 %v338_v56, %v2198_v10 }
 0x43e   :  { %834 = vmatpush.msra.mxu3 %v2222_v35 }
 0x43f   :  { %1869 = vtanh.f32 %v339_v58  ;;  %v1765_v62 = vmul.f32 -1.442695, %v339_v58 }
 0x440   :  { %835 = vmatpush.msra.mxu3 %v2229_v36  ;;  %1871 = vtanh.f32 %v2420_v29 }
 0x441   :  { %1873 = vpow2.f32 %v1765_v62 }
 0x442   :  { %836 = vmatpush.msra.mxu3 %v2236_v37 }
 0x444   :  { %837 = vmatpush.msra.mxu3 %v2243_v38 }
 0x445   :  { %v1870_v60 = vpop.eup %1869 }
 0x446   :  { %367 = vrot.lane.b32.xlu2 %v1870_v60, %s2082_s12  ;;  %838 = vmatpush.msra.mxu3 %v2254_v41  ;;  %v1872_v61 = vpop.eup %1871 }
 0x447   :  { %v1874_v63 = vpop.eup %1873 }
 0x448   :  { %v344_v7 = vadd.f32 1.0, %v1874_v63 }
 0x44a   :  { %1875 = vrcp.f32 %v344_v7  ;;  %v356_v27 = vand.u32 2147483648, %v344_v7  ;;  %vm350_vm4 = vweird.f32 %v344_v7  ;;  %v354_v30 = vand.u32 2147483647, %v344_v7 }
 0x44c   :  { %v357_v29 = vor.u32 1.1754944e-38, %v356_v27  ;;  %vm355_vm6 = vcmp.eq.f32.partialorder %v354_v30, 8.507059e+37 }
 0x44e   :  { %223 = vrot.lane.b32.xlu2 %v1872_v61, %s2085_s15 }
 0x450   :  { %v1876_v9 = vpop.eup %1875 }
 0x451   :  { %v346_v11 = vmul.f32 %v1876_v9, %v344_v7  ;;  %vm351_vm3 = vweird.f32 %v1876_v9 }
 0x452   :  { %vm352_vm5 = vmor %vm350_vm4, %vm351_vm3 }
 0x453   :  { %v347_v12 = vsub.f32 1.0, %v346_v11 }
 0x455   :  { %v348_v14 = vmul.f32 %v1876_v9, %v347_v12 }
 0x457   :  { %v349_v26 = vadd.f32 %v1876_v9, %v348_v14 }
 0x459   :  { %v353_v32 = vsel %vm352_vm5, %v1876_v9, %v349_v26 }
 0x45a   :  { %v358_v40 = vsel %vm355_vm6, %v357_v29, %v353_v32 }
 0x4a0   :  { %v368_v39 = vpop.permute.xlu2 %367 }
 0x4a1   :  { %v370_v42 = vmul.f32 %v368_v39, %v358_v40 }
 0x4a3   :  { %372 = vrot.lane.b32.xlu1 %v370_v42, %s2083_s13 }
 0x4a8   :  { %v224_v48 = vpop.permute.xlu2 %223 }
 0x4a9   :  { %v2516_v49 = vmul.f32 %v224_v48, %v2333_v13 }
 0x4ab   :  { %386 = vrot.lane.b32.xlu2 %v2516_v49, %s2082_s12 }
 0x4bc   :  { %v284_v56 = vpop.f32.mrf.mxu3 }
 0x4bd   :  { %v285_v58 = vadd.f32 %v284_v56, %v2523_v50 }
 0x4bf   :  { %v1761_v60 = vmul.f32 -1.442695, %v285_v58 }
 0x4c1   :  { %1877 = vpow2.f32 %v1761_v60 }
 0x4c7   :  { %v1878_v61 = vpop.eup %1877 }
 0x4c8   :  { %v290_v62 = vadd.f32 1.0, %v1878_v61 }
 0x4ca   :  { %1879 = vrcp.f32 %v290_v62  ;;  %v302_v9 = vand.u32 2147483648, %v290_v62  ;;  %v300_v12 = vand.u32 2147483647, %v290_v62  ;;  %vm296_vm11 = vweird.f32 %v290_v62 }
 0x4cc   :  { %v303_v26 = vor.u32 1.1754944e-38, %v302_v9  ;;  %vm301_vm13 = vcmp.eq.f32.partialorder %v300_v12, 8.507059e+37 }
 0x4d0   :  { %v1880_v63 = vpop.eup %1879 }
 0x4d1   :  { %v292_v7 = vmul.f32 %v1880_v63, %v290_v62  ;;  %vm297_vm10 = vweird.f32 %v1880_v63 }
 0x4d2   :  { %vm298_vm12 = vmor %vm296_vm11, %vm297_vm10 }
 0x4d3   :  { %v293_v13 = vsub.f32 1.0, %v292_v7 }
 0x4d5   :  { %v294_v11 = vmul.f32 %v1880_v63, %v293_v13 }
 0x4d7   :  { %v295_v14 = vadd.f32 %v1880_v63, %v294_v11 }
 0x4d9   :  { %v299_v27 = vsel %vm298_vm12, %v1880_v63, %v295_v14 }
 0x4da   :  { %v304_v30 = vsel %vm301_vm13, %v303_v26, %v299_v27 }
 0x4db   :  { %362 = vrot.lane.b32.xlu0 %v304_v30, %s2083_s13 }
 0x505   :  { %v387_v60 = vpop.permute.xlu2 %386 }
 0x515   :  { %v373_v39 = vpop.permute.xlu1 %372 }
 0x54d   :  { %v363_v32 = vpop.permute.xlu0 %362 }
 0x54e   :  { %v365_v29 = vmul.f32 %v363_v32, %v358_v40 }
 0x550   :  { %v375_v42 = vadd.f32 %v373_v39, %v365_v29 }
 0x552   :  { %1881 = vtanh.f32 %v375_v42  ;;  %451 = vrot.lane.b32.xlu2 %v375_v42, %s2084_s14 }
 0x558   :  { %v1882_v48 = vpop.eup %1881 }
 0x559   :  { %378 = vrot.lane.b32.xlu0 %v1882_v48, %s2085_s15 }
 0x5cb   :  { %v379_v56 = vpop.permute.xlu0 %378 }
 0x5cc   :  { %v381_v58 = vmul.f32 %v379_v56, %v358_v40 }
 0x5ce   :  { %383 = vrot.lane.b32.xlu1 %v381_v58, %s2086_s27 }
 0x640   :  { %v384_v61 = vpop.permute.xlu1 %383 }
 0x641   :  { %v389_v62 = vsel %vm160_vm8, %v384_v61, %v387_v60 }
 0x642   :  { %1767 = vmatmul.msk.f32.vlgmr.msra.gmra.mxu2 %vm162_vm9, %v389_v62 }
 0x643   :  { %1795 = vmatpush.msk.msra.mxu2 %vm166_vm7, %v2267_v51 }
 0x645   :  { %898 = vmatpush.msra.mxu2 %v2272_v52 }
 0x647   :  { %899 = vmatpush.msra.mxu2 %v2281_v53 }
 0x649   :  { %900 = vmatpush.msra.mxu2 %v2288_v54 }
 0x64b   :  { %901 = vmatpush.msra.mxu2 %v2295_v55 }
 0x64d   :  { %902 = vmatpush.msra.mxu2 %v2302_v57 }
 0x64f   :  { %903 = vmatpush.msra.mxu2 %v2309_v59 }
 0x6c5   :  { %v410_v40 = vpop.f32.mrf.mxu2 }
 0x6c6   :  { %v411_v63 = vadd.f32 %v410_v40, %v2260_v44 }
 0x6c8   :  { %1883 = vtanh.f32 %v411_v63  ;;  %v1768_v13 = vmul.f32 -1.442695, %v411_v63  ;;  %v452_v63 = vpop.permute.xlu2 %451 }
 0x6ca   :  { %1885 = vpow2.f32 %v1768_v13  ;;  %v1775_v13 = vld [vmem:[%s3071_s0 + $0x2] sm:$0x1] }
 0x6ce   :  { %v1884_v7 = vpop.eup %1883 }
 0x6cf   :  { %435 = vrot.lane.b32.xlu0 %v1884_v7, %s2082_s12 }
 0x6d0   :  { %v1886_v9 = vpop.eup %1885 }
 0x6d1   :  { %v416_v11 = vadd.f32 1.0, %v1886_v9 }
 0x6d3   :  { %1887 = vrcp.f32 %v416_v11  ;;  %v428_v29 = vand.u32 2147483648, %v416_v11  ;;  %vm422_vm4 = vweird.f32 %v416_v11  ;;  %v426_v39 = vand.u32 2147483647, %v416_v11 }
 0x6d5   :  { %v429_v48 = vor.u32 1.1754944e-38, %v428_v29  ;;  %vm427_vm6 = vcmp.eq.f32.partialorder %v426_v39, 8.507059e+37 }
 0x6d7   :  { %529 = vrot.lane.b32.xlu0 %v381_v58, %s2087_s28 }
 0x6d9   :  { %v1888_v12 = vpop.eup %1887 }
 0x6da   :  { %v418_v14 = vmul.f32 %v1888_v12, %v416_v11  ;;  %vm423_vm3 = vweird.f32 %v1888_v12 }
 0x6db   :  { %vm424_vm5 = vmor %vm422_vm4, %vm423_vm3 }
 0x6dc   :  { %v419_v26 = vsub.f32 1.0, %v418_v14 }
 0x6de   :  { %v420_v27 = vmul.f32 %v1888_v12, %v419_v26 }
 0x6e0   :  { %v421_v32 = vadd.f32 %v1888_v12, %v420_v27 }
 0x6e2   :  { %v425_v42 = vsel %vm424_vm5, %v1888_v12, %v421_v32 }
 0x6e3   :  { %v2543_v58 = vsel %vm427_vm6, %v429_v48, %v425_v42 }
 0x6e4   :  { %v433_v61 = vmul.f32 %v2543_v58, %v304_v30 }
 0x741   :  { %v436_v56 = vpop.permute.xlu0 %435 }
 0x742   :  { %v438_v60 = vmul.f32 %v436_v56, %v2543_v58 }
 0x744   :  { %440 = vrot.lane.b32.xlu1 %v438_v60, %s2083_s13 }
 0x749   :  { %v530_v9 = vpop.permute.xlu0 %529 }
 0x74a   :  { %v532_v30 = vsel %vm89_vm1, %v1775_v13, %v530_v9 }
 0x7b6   :  { %v441_v62 = vpop.permute.xlu1 %440 }
 0x7b7   :  { %v443_v40 = vadd.f32 %v441_v62, %v433_v61 }
 0x7b9   :  { %v454_v7 = vsel %vm160_vm8, %v452_v63, %v443_v40 }
 0x7ba   :  { %1770 = vmatmul.msk.f32.vlgmr.msrb.gmra.mxu0 %vm162_vm9, %v454_v7 }
 0x7bb   :  { %1789 = vmatpush.msk.msrb.mxu0 %vm95_vm0, %v2144_v0 }
 0x7bd   :  { %760 = vmatpush.msrb.mxu0 %v2149_v1 }
 0x7bf   :  { %761 = vmatpush.msrb.mxu0 %v2156_v2 }
 0x7c1   :  { %762 = vmatpush.msrb.mxu0 %v2162_v3 }
 0x7c2   :  { %1777 = vmatmul.msk.f32.vlgmr.msra.gmra.mxu0 %vm91_vm2, %v532_v30 }
 0x7c3   :  { %763 = vmatpush.msrb.mxu0 %v2168_v4 }
 0x7c5   :  { %764 = vmatpush.msrb.mxu0 %v2174_v5 }
 0x7c7   :  { %765 = vmatpush.msrb.mxu0 %v2180_v6 }
 0x7c9   :  { %766 = vmatpush.msrb.mxu0 %v2189_v8 }
 0x7cb   :  { %1802 = vmatpush.msk.msra.mxu0 %vm95_vm0, %v2144_v0 }
 0x7cd   :  { %975 = vmatpush.msra.mxu0 %v2149_v1 }
 0x7cf   :  { %976 = vmatpush.msra.mxu0 %v2156_v2 }
 0x7d1   :  { %977 = vmatpush.msra.mxu0 %v2162_v3 }
 0x7d3   :  { %978 = vmatpush.msra.mxu0 %v2168_v4 }
 0x7d5   :  { %979 = vmatpush.msra.mxu0 %v2174_v5 }
 0x7d7   :  { %980 = vmatpush.msra.mxu0 %v2180_v6 }
 0x7d9   :  { %981 = vmatpush.msra.mxu0 %v2189_v8 }
 0x837   :  { %v475_v11 = vpop.f32.mrf.mxu0 }
 0x838   :  { %v476_v12 = vadd.f32 %v475_v11, %v2498_v47 }
 0x83a   :  { %v478_v14 = vmax.f32 %v476_v12, 0.0 }
 0x83c   :  { %1772 = vmatmul.msk.f32.vlgmr.msrb.gmra.mxu2 %vm259_vm15, %v478_v14 }
 0x83d   :  { %1805 = vmatpush.msk.msrb.mxu2 %vm166_vm7, %v2208_v33 }
 0x83f   :  { %v553_v0 = vpop.f32.mrf.mxu0  ;;  %1048 = vmatpush.msrb.mxu2 %v2213_v34 }
 0x840   :  { %v554_v1 = vadd.f32 %v553_v0, %v2198_v10 }
 0x841   :  { %1049 = vmatpush.msrb.mxu2 %v2222_v35 }
 0x842   :  { %1889 = vtanh.f32 %v554_v1  ;;  %v1778_v4 = vmul.f32 -1.442695, %v554_v1 }
 0x843   :  { %1050 = vmatpush.msrb.mxu2 %v2229_v36  ;;  %1891 = vtanh.f32 %v443_v40 }
 0x844   :  { %1893 = vpow2.f32 %v1778_v4 }
 0x845   :  { %1051 = vmatpush.msrb.mxu2 %v2236_v37 }
 0x847   :  { %1052 = vmatpush.msrb.mxu2 %v2243_v38 }
 0x848   :  { %v1890_v2 = vpop.eup %1889 }
 0x849   :  { %582 = vrot.lane.b32.xlu1 %v1890_v2, %s2082_s12  ;;  %1053 = vmatpush.msrb.mxu2 %v2254_v41  ;;  %v1892_v3 = vpop.eup %1891 }
 0x84a   :  { %v1894_v5 = vpop.eup %1893 }
 0x84b   :  { %v559_v6 = vadd.f32 1.0, %v1894_v5 }
 0x84d   :  { %1895 = vrcp.f32 %v559_v6  ;;  %v571_v36 = vand.u32 2147483648, %v559_v6  ;;  %vm565_vm11 = vweird.f32 %v559_v6  ;;  %v569_v37 = vand.u32 2147483647, %v559_v6 }
 0x84f   :  { %v572_v26 = vor.u32 1.1754944e-38, %v571_v36  ;;  %vm570_vm13 = vcmp.eq.f32.partialorder %v569_v37, 8.507059e+37 }
 0x851   :  { %446 = vrot.lane.b32.xlu1 %v1892_v3, %s2085_s15 }
 0x853   :  { %v1896_v8 = vpop.eup %1895 }
 0x854   :  { %v561_v10 = vmul.f32 %v1896_v8, %v559_v6  ;;  %vm566_vm10 = vweird.f32 %v1896_v8 }
 0x855   :  { %vm567_vm12 = vmor %vm565_vm11, %vm566_vm10 }
 0x856   :  { %v562_v33 = vsub.f32 1.0, %v561_v10 }
 0x858   :  { %v563_v34 = vmul.f32 %v1896_v8, %v562_v33 }
 0x85a   :  { %v564_v35 = vadd.f32 %v1896_v8, %v563_v34 }
 0x85c   :  { %v568_v38 = vsel %vm567_vm12, %v1896_v8, %v564_v35 }
 0x85d   :  { %v573_v32 = vsel %vm570_vm13, %v572_v26, %v568_v38 }
 0x8bb   :  { %v583_v27 = vpop.permute.xlu1 %582 }
 0x8bc   :  { %v585_v29 = vmul.f32 %v583_v27, %v573_v32 }
 0x8be   :  { %587 = vrot.lane.b32.xlu0 %v585_v29, %s2083_s13 }
 0x8bf   :  { %v499_v39 = vpop.f32.mrf.mxu2 }
 0x8c0   :  { %v500_v42 = vadd.f32 %v499_v39, %v2523_v50 }
 0x8c2   :  { %v1773_v48 = vmul.f32 -1.442695, %v500_v42  ;;  %v1788_v42 = vld [vmem:[%s3071_s0 + $0x3] sm:$0x1] }
 0x8c3   :  { %v447_v56 = vpop.permute.xlu1 %446 }
 0x8c4   :  { %1897 = vpow2.f32 %v1773_v48  ;;  %v2589_v60 = vmul.f32 %v447_v56, %v2543_v58 }
 0x8c6   :  { %601 = vrot.lane.b32.xlu1 %v2589_v60, %s2082_s12 }
 0x8ca   :  { %v1898_v61 = vpop.eup %1897 }
 0x8cb   :  { %v505_v62 = vadd.f32 1.0, %v1898_v61 }
 0x8cd   :  { %1899 = vrcp.f32 %v505_v62  ;;  %v517_v13 = vand.u32 2147483648, %v505_v62  ;;  %v515_v30 = vand.u32 2147483647, %v505_v62  ;;  %vm511_vm4 = vweird.f32 %v505_v62 }
 0x8cf   :  { %v518_v12 = vor.u32 1.1754944e-38, %v517_v13  ;;  %vm516_vm6 = vcmp.eq.f32.partialorder %v515_v30, 8.507059e+37 }
 0x8d3   :  { %v1900_v40 = vpop.eup %1899 }
 0x8d4   :  { %v507_v63 = vmul.f32 %v1900_v40, %v505_v62  ;;  %vm512_vm3 = vweird.f32 %v1900_v40 }
 0x8d5   :  { %vm513_vm5 = vmor %vm511_vm4, %vm512_vm3 }
 0x8d6   :  { %v508_v7 = vsub.f32 1.0, %v507_v63 }
 0x8d8   :  { %v509_v9 = vmul.f32 %v1900_v40, %v508_v7 }
 0x8da   :  { %v510_v11 = vadd.f32 %v1900_v40, %v509_v9  ;;  %v2654_v9 = vld [vmem:[%s3073_s2] sm:$0x1] }
 0x8dc   :  { %v514_v14 = vsel %vm513_vm5, %v1900_v40, %v510_v11 }
 0x8dd   :  { %v2593_v58 = vsel %vm516_vm6, %v518_v12, %v514_v14  ;;  %v2673_v12 = vld [vmem:[%s3074_s3 + $0x30] sm:$0x3] }
 0x8de   :  { %577 = vrot.lane.b32.xlu2 %v2593_v58, %s2083_s13 }
 0x930   :  { %v588_v2 = vpop.permute.xlu0 %587 }
 0x938   :  { %v578_v0 = vpop.permute.xlu2 %577  ;;  %v602_v8 = vpop.permute.xlu1 %601 }
 0x939   :  { %v580_v1 = vmul.f32 %v578_v0, %v573_v32 }
 0x93b   :  { %v590_v3 = vadd.f32 %v588_v2, %v580_v1  ;;  %v2680_v1 = vld [vmem:[%s3074_s3 + $0x28] sm:$0xff]  ;;  %v2687_v2 = vld [vmem:[%s3074_s3 + $0x20] sm:$0xff] }
 0x93d   :  { %1901 = vtanh.f32 %v590_v3  ;;  %666 = vrot.lane.b32.xlu1 %v590_v3, %s2084_s14  ;;  %v2693_v3 = vld [vmem:[%s3074_s3 + $0x18] sm:$0xff] }
 0x943   :  { %v1902_v4 = vpop.eup %1901 }
 0x944   :  { %593 = vrot.lane.b32.xlu2 %v1902_v4, %s2085_s15  ;;  %v2699_v4 = vld [vmem:[%s3074_s3 + $0x10] sm:$0xff] }
 0x99e   :  { %v594_v5 = vpop.permute.xlu2 %593 }
 0x99f   :  { %v596_v6 = vmul.f32 %v594_v5, %v573_v32 }
 0x9a1   :  { %598 = vrot.lane.b32.xlu0 %v596_v6, %s2086_s27 }
 0x9af   :  { %v667_v63 = vpop.permute.xlu1 %666 }
 0xa13   :  { %v599_v10 = vpop.permute.xlu0 %598 }
 0xa14   :  { %v604_v33 = vsel %vm160_vm8, %v599_v10, %v602_v8  ;;  %v2708_v8 = vld [vmem:[%s3074_s3 + $0x8] sm:$0xff] }
 0xa15   :  { %1780 = vmatmul.msk.f32.vlgmr.msrb.gmra.mxu1 %vm162_vm9, %v604_v33 }
 0xa16   :  { %1808 = vmatpush.msk.msrb.mxu1 %vm166_vm7, %v2267_v51 }
 0xa18   :  { %1113 = vmatpush.msrb.mxu1 %v2272_v52 }
 0xa1a   :  { %1114 = vmatpush.msrb.mxu1 %v2281_v53 }
 0xa1c   :  { %1115 = vmatpush.msrb.mxu1 %v2288_v54 }
 0xa1e   :  { %1116 = vmatpush.msrb.mxu1 %v2295_v55 }
 0xa20   :  { %1117 = vmatpush.msrb.mxu1 %v2302_v57 }
 0xa22   :  { %1118 = vmatpush.msrb.mxu1 %v2309_v59 }
 0xa92   :  { %v625_v34 = vpop.f32.mrf.mxu1 }
 0xa93   :  { %v626_v35 = vadd.f32 %v625_v34, %v2260_v44 }
 0xa95   :  { %1903 = vtanh.f32 %v626_v35  ;;  %v1781_v51 = vmul.f32 -1.442695, %v626_v35 }
 0xa97   :  { %1905 = vpow2.f32 %v1781_v51 }
 0xa9b   :  { %v1904_v36 = vpop.eup %1903 }
 0xa9c   :  { %650 = vrot.lane.b32.xlu2 %v1904_v36, %s2082_s12 }
 0xa9d   :  { %v1906_v52 = vpop.eup %1905 }
 0xa9e   :  { %v631_v53 = vadd.f32 1.0, %v1906_v52 }
 0xaa0   :  { %1907 = vrcp.f32 %v631_v53  ;;  %v643_v59 = vand.u32 2147483648, %v631_v53  ;;  %vm637_vm11 = vweird.f32 %v631_v53  ;;  %v641_v44 = vand.u32 2147483647, %v631_v53 }
 0xaa2   :  { %v644_v27 = vor.u32 1.1754944e-38, %v643_v59  ;;  %vm642_vm13 = vcmp.eq.f32.partialorder %v641_v44, 8.507059e+37 }
 0xaa4   :  { %744 = vrot.lane.b32.xlu2 %v596_v6, %s2087_s28 }
 0xaa6   :  { %v1908_v54 = vpop.eup %1907 }
 0xaa7   :  { %v633_v55 = vmul.f32 %v1908_v54, %v631_v53  ;;  %vm638_vm10 = vweird.f32 %v1908_v54 }
 0xaa8   :  { %vm639_vm12 = vmor %vm637_vm11, %vm638_vm10 }
 0xaa9   :  { %v634_v37 = vsub.f32 1.0, %v633_v55 }
 0xaab   :  { %v635_v57 = vmul.f32 %v1908_v54, %v634_v37 }
 0xaad   :  { %v636_v38 = vadd.f32 %v1908_v54, %v635_v57 }
 0xaaf   :  { %v640_v26 = vsel %vm639_vm12, %v1908_v54, %v636_v38 }
 0xab0   :  { %v2613_v29 = vsel %vm642_vm13, %v644_v27, %v640_v26 }
 0xab1   :  { %v648_v61 = vmul.f32 %v2613_v29, %v2593_v58 }
 0xaf6   :  { %v651_v32 = vpop.permute.xlu2 %650 }
 0xaf7   :  { %v653_v39 = vmul.f32 %v651_v32, %v2613_v29 }
 0xaf9   :  { %655 = vrot.lane.b32.xlu0 %v653_v39, %s2083_s13 }
 0xafe   :  { %v745_v48 = vpop.permute.xlu2 %744 }
 0xaff   :  { %v747_v56 = vsel %vm89_vm1, %v1788_v42, %v745_v48 }
 0xb00   :  { %1790 = vmatmul.msk.f32.vlgmr.msrb.gmra.mxu0 %vm91_vm2, %v747_v56 }
 0xb01   :  { %1810 = vmatpush.msk.msrb.mxu0 %vm263_vm14, %v2340_v15 }
 0xb03   :  { %1128 = vmatpush.msrb.mxu0 %v2345_v16 }
 0xb05   :  { %1129 = vmatpush.msrb.mxu0 %v2354_v17 }
 0xb07   :  { %1130 = vmatpush.msrb.mxu0 %v2361_v18 }
 0xb09   :  { %1131 = vmatpush.msrb.mxu0 %v2368_v19 }
 0xb0b   :  { %1132 = vmatpush.msrb.mxu0 %v2375_v20 }
 0xb0d   :  { %1133 = vmatpush.msrb.mxu0 %v2382_v21 }
 0xb0f   :  { %1134 = vmatpush.msrb.mxu0 %v2389_v22 }
 0xb11   :  { %1135 = vmatpush.msrb.mxu0 %v2396_v23 }
 0xb13   :  { %1136 = vmatpush.msrb.mxu0 %v2403_v24 }
 0xb15   :  { %1137 = vmatpush.msrb.mxu0 %v2410_v25 }
 0xb17   :  { %1138 = vmatpush.msrb.mxu0 %v2418_v28 }
 0xb19   :  { %1139 = vmatpush.msrb.mxu0 %v2427_v31 }
 0xb1b   :  { %1140 = vmatpush.msrb.mxu0 %v2466_v43 }
 0xb1d   :  { %1141 = vmatpush.msrb.mxu0 %v2473_v45 }
 0xb1f   :  { %1142 = vmatpush.msrb.mxu0 %v2481_v46 }
 0xb6b   :  { %v656_v62 = vpop.permute.xlu0 %655 }
 0xb6c   :  { %v658_v40 = vadd.f32 %v656_v62, %v648_v61  ;;  %v2018_v62 = vld [vmem:[%s3076_s5 + $0x30] sm:$0x3] }
 0xb6e   :  { %v669_v7 = vsel %vm160_vm8, %v667_v63, %v658_v40  ;;  %v2020_v63 = vld [vmem:[%s3076_s5 + $0x20] sm:$0xff] }
 0xb6f   :  { %1783 = vmatmul.msk.f32.vlgmr.msrb.gmra.mxu3 %vm162_vm9, %v669_v7  ;;  %v2021_v7 = vld [vmem:[%s3076_s5 + $0x18] sm:$0xff] }
 0xb70   :  { %1797 = vmatpush.msk.msrb.mxu3 %vm263_vm14, %v2340_v15 }
 0xb72   :  { %913 = vmatpush.msrb.mxu3 %v2345_v16 }
 0xb74   :  { %914 = vmatpush.msrb.mxu3 %v2354_v17 }
 0xb76   :  { %915 = vmatpush.msrb.mxu3 %v2361_v18 }
 0xb78   :  { %916 = vmatpush.msrb.mxu3 %v2368_v19 }
 0xb7a   :  { %917 = vmatpush.msrb.mxu3 %v2375_v20 }
 0xb7c   :  { %918 = vmatpush.msrb.mxu3 %v2382_v21 }
 0xb7d   :  { %v768_v13 = vpop.f32.mrf.mxu0 }
 0xb7e   :  { %v769_v15 = vadd.f32 %v2654_v9, %v768_v13  ;;  %919 = vmatpush.msrb.mxu3 %v2389_v22  ;;  %v2022_v13 = vld [vmem:[%s3076_s5 + $0x10] sm:$0xff] }
 0xb80   :  { %1909 = vtanh.f32 %v769_v15  ;;  %920 = vmatpush.msrb.mxu3 %v2396_v23  ;;  %v1791_v18 = vmul.f32 -1.442695, %v769_v15  ;;  %v2023_v15 = vld [vmem:[%s3076_s5 + $0x8] sm:$0xff] }
 0xb81   :  { %1911 = vtanh.f32 %v658_v40  ;;  %v2019_v40 = vld [vmem:[%s3076_s5 + $0x28] sm:$0xff] }
 0xb82   :  { %921 = vmatpush.msrb.mxu3 %v2403_v24  ;;  %1913 = vpow2.f32 %v1791_v18  ;;  %v2746_v18 = vld [vmem:[#allocation2] sm:$0x1] }
 0xb84   :  { %922 = vmatpush.msrb.mxu3 %v2410_v25 }
 0xb86   :  { %v1910_v16 = vpop.eup %1909  ;;  %923 = vmatpush.msrb.mxu3 %v2418_v28 }
 0xb87   :  { %797 = vrot.lane.b32.xlu0 %v1910_v16, %s2082_s12  ;;  %v1912_v17 = vpop.eup %1911  ;;  %v2024_v16 = vld [vmem:[%s3076_s5] sm:$0xff] }
 0xb88   :  { %924 = vmatpush.msrb.mxu3 %v2427_v31  ;;  %v1914_v19 = vpop.eup %1913 }
 0xb89   :  { %v774_v20 = vadd.f32 1.0, %v1914_v19 }
 0xb8a   :  { %925 = vmatpush.msrb.mxu3 %v2466_v43 }
 0xb8b   :  { %1915 = vrcp.f32 %v774_v20  ;;  %v786_v43 = vand.u32 2147483648, %v774_v20  ;;  %vm780_vm4 = vweird.f32 %v774_v20 }
 0xb8c   :  { %926 = vmatpush.msrb.mxu3 %v2473_v45  ;;  %v784_v45 = vand.u32 2147483647, %v774_v20 }
 0xb8d   :  { %v787_v11 = vor.u32 1.1754944e-38, %v786_v43 }
 0xb8e   :  { %927 = vmatpush.msrb.mxu3 %v2481_v46  ;;  %vm785_vm6 = vcmp.eq.f32.partialorder %v784_v45, 8.507059e+37 }
 0xb8f   :  { %661 = vrot.lane.b32.xlu0 %v1912_v17, %s2085_s15 }
 0xb91   :  { %v1916_v21 = vpop.eup %1915 }
 0xb92   :  { %v776_v22 = vmul.f32 %v1916_v21, %v774_v20  ;;  %vm781_vm3 = vweird.f32 %v1916_v21 }
 0xb93   :  { %vm782_vm5 = vmor %vm780_vm4, %vm781_vm3 }
 0xb94   :  { %v777_v23 = vsub.f32 1.0, %v776_v22 }
 0xb96   :  { %v778_v24 = vmul.f32 %v1916_v21, %v777_v23 }
 0xb98   :  { %v779_v28 = vadd.f32 %v1916_v21, %v778_v24 }
 0xb9a   :  { %v783_v30 = vsel %vm782_vm5, %v1916_v21, %v779_v28 }
 0xb9b   :  { %v788_v14 = vsel %vm785_vm6, %v787_v11, %v783_v30 }
 0xbf2   :  { %v690_v25 = vpop.f32.mrf.mxu3 }
 0xbf3   :  { %v691_v31 = vadd.f32 %v690_v25, %v2498_v47 }
 0xbf5   :  { %v693_v46 = vmax.f32 %v691_v31, 0.0 }
 0xbf7   :  { %1785 = vmatmul.msk.f32.vlgmr.msra.gmra.mxu1 %vm259_vm15, %v693_v46 }
 0xbf8   :  { %1818 = vmatpush.msk.msra.mxu1 %vm166_vm7, %v2673_v12 }
 0xbf9   :  { %v798_v58 = vpop.permute.xlu0 %797 }
 0xbfa   :  { %v800_v0 = vmul.f32 %v798_v58, %v788_v14  ;;  %1263 = vmatpush.msra.mxu1 %v2680_v1 }
 0xbfc   :  { %802 = vrot.lane.b32.xlu2 %v800_v0, %s2083_s13  ;;  %1264 = vmatpush.msra.mxu1 %v2687_v2 }
 0xbfe   :  { %1265 = vmatpush.msra.mxu1 %v2693_v3 }
 0xc00   :  { %1266 = vmatpush.msra.mxu1 %v2699_v4 }
 0xc01   :  { %v662_v5 = vpop.permute.xlu0 %661 }
 0xc02   :  { %v2703_v6 = vmul.f32 %v662_v5, %v2613_v29  ;;  %1267 = vmatpush.msra.mxu1 %v2708_v8  ;;  %v1801_v5 = vld [vmem:[%s3071_s0 + $0x4] sm:$0x1] }
 0xc04   :  { %816 = vrot.lane.b32.xlu0 %v2703_v6, %s2082_s12  ;;  %1268 = vmatpush.msra.mxu1 %v2254_v41 }
 0xc56   :  { %v803_v27 = vpop.permute.xlu2 %802 }
 0xc74   :  { %v714_v10 = vpop.f32.mrf.mxu1 }
 0xc75   :  { %v715_v33 = vadd.f32 %v714_v10, %v2523_v50 }
 0xc76   :  { %v817_v48 = vpop.permute.xlu0 %816 }
 0xc77   :  { %v1786_v34 = vmul.f32 -1.442695, %v715_v33 }
 0xc79   :  { %1917 = vpow2.f32 %v1786_v34 }
 0xc7f   :  { %v1918_v35 = vpop.eup %1917 }
 0xc80   :  { %v720_v36 = vadd.f32 1.0, %v1918_v35 }
 0xc82   :  { %1919 = vrcp.f32 %v720_v36  ;;  %v732_v54 = vand.u32 2147483648, %v720_v36  ;;  %v730_v37 = vand.u32 2147483647, %v720_v36  ;;  %vm726_vm11 = vweird.f32 %v720_v36 }
 0xc84   :  { %v733_v38 = vor.u32 1.1754944e-38, %v732_v54  ;;  %vm731_vm13 = vcmp.eq.f32.partialorder %v730_v37, 8.507059e+37  ;;  %v2775_v54 = vld [vmem:[%s3072_s1 + $0x30] sm:$0xff]  ;;  %v2787_v37 = vld [vmem:[%s3072_s1 + $0x20] sm:$0xff] }
 0xc88   :  { %v1920_v51 = vpop.eup %1919 }
 0xc89   :  { %v722_v52 = vmul.f32 %v1920_v51, %v720_v36  ;;  %vm727_vm10 = vweird.f32 %v1920_v51 }
 0xc8a   :  { %vm728_vm12 = vmor %vm726_vm11, %vm727_vm10 }
 0xc8b   :  { %v723_v53 = vsub.f32 1.0, %v722_v52 }
 0xc8d   :  { %v724_v55 = vmul.f32 %v1920_v51, %v723_v53  ;;  %v2768_v53 = vld [vmem:[%s3072_s1 + $0x38] sm:$0x1] }
 0xc8f   :  { %v725_v57 = vadd.f32 %v1920_v51, %v724_v55  ;;  %v2781_v55 = vld [vmem:[%s3072_s1 + $0x28] sm:$0xff] }
 0xc91   :  { %v729_v41 = vsel %vm728_vm12, %v1920_v51, %v725_v57  ;;  %v2793_v57 = vld [vmem:[%s3072_s1 + $0x18] sm:$0xff] }
 0xc92   :  { %v2715_v59 = vsel %vm731_vm13, %v733_v38, %v729_v41  ;;  %v2799_v38 = vld [vmem:[%s3072_s1 + $0x10] sm:$0xff]  ;;  %v2805_v41 = vld [vmem:[%s3072_s1 + $0x8] sm:$0xff] }
 0xc93   :  { %792 = vrot.lane.b32.xlu1 %v2715_v59, %s2083_s13 }
 0xd05   :  { %v793_v44 = vpop.permute.xlu1 %792 }
 0xd06   :  { %v795_v26 = vmul.f32 %v793_v44, %v788_v14 }
 0xd08   :  { %v805_v32 = vadd.f32 %v803_v27, %v795_v26 }
 0xd0a   :  { %1921 = vtanh.f32 %v805_v32  ;;  %881 = vrot.lane.b32.xlu0 %v805_v32, %s2084_s14 }
 0xd10   :  { %v1922_v29 = vpop.eup %1921 }
 0xd11   :  { %808 = vrot.lane.b32.xlu1 %v1922_v29, %s2085_s15 }
 0xd7c   :  { %v882_v51 = vpop.permute.xlu0 %881 }
 0xd83   :  { %v809_v39 = vpop.permute.xlu1 %808 }
 0xd84   :  { %v811_v42 = vmul.f32 %v809_v39, %v788_v14 }
 0xd86   :  { %813 = vrot.lane.b32.xlu2 %v811_v42, %s2086_s27 }
 0xde0   :  { %v814_v56 = vpop.permute.xlu2 %813 }
 0xde1   :  { %v819_v61 = vsel %vm160_vm8, %v814_v56, %v817_v48 }
 0xde2   :  { %1793 = vmatmul.msk.f32.vlgmr.msra.gmra.mxu3 %vm162_vm9, %v819_v61 }
 0xde3   :  { %1821 = vmatpush.msk.msra.mxu3 %vm166_vm7, %v2018_v62 }
 0xde5   :  { %1328 = vmatpush.msra.mxu3 %v2019_v40 }
 0xde7   :  { %1329 = vmatpush.msra.mxu3 %v2020_v63 }
 0xde9   :  { %1330 = vmatpush.msra.mxu3 %v2021_v7 }
 0xdeb   :  { %1331 = vmatpush.msra.mxu3 %v2022_v13 }
 0xded   :  { %1332 = vmatpush.msra.mxu3 %v2023_v15 }
 0xdef   :  { %1333 = vmatpush.msra.mxu3 %v2024_v16 }
 0xe65   :  { %v840_v17 = vpop.f32.mrf.mxu3 }
 0xe66   :  { %v841_v19 = vadd.f32 %v2746_v18, %v840_v17 }
 0xe68   :  { %1923 = vtanh.f32 %v841_v19  ;;  %v1794_v21 = vmul.f32 -1.442695, %v841_v19 }
 0xe6a   :  { %1925 = vpow2.f32 %v1794_v21 }
 0xe6e   :  { %v1924_v20 = vpop.eup %1923 }
 0xe6f   :  { %865 = vrot.lane.b32.xlu1 %v1924_v20, %s2082_s12 }
 0xe70   :  { %v1926_v22 = vpop.eup %1925 }
 0xe71   :  { %v846_v23 = vadd.f32 1.0, %v1926_v22 }
 0xe73   :  { %1927 = vrcp.f32 %v846_v23  ;;  %v858_v45 = vand.u32 2147483648, %v846_v23  ;;  %vm852_vm4 = vweird.f32 %v846_v23  ;;  %v856_v46 = vand.u32 2147483647, %v846_v23 }
 0xe75   :  { %v859_v11 = vor.u32 1.1754944e-38, %v858_v45  ;;  %vm857_vm6 = vcmp.eq.f32.partialorder %v856_v46, 8.507059e+37 }
 0xe77   :  { %959 = vrot.lane.b32.xlu1 %v811_v42, %s2087_s28 }
 0xe79   :  { %v1928_v24 = vpop.eup %1927 }
 0xe7a   :  { %v848_v25 = vmul.f32 %v1928_v24, %v846_v23  ;;  %vm853_vm3 = vweird.f32 %v1928_v24 }
 0xe7b   :  { %vm854_vm5 = vmor %vm852_vm4, %vm853_vm3 }
 0xe7c   :  { %v849_v28 = vsub.f32 1.0, %v848_v25 }
 0xe7e   :  { %v850_v31 = vmul.f32 %v1928_v24, %v849_v28 }
 0xe80   :  { %v851_v43 = vadd.f32 %v1928_v24, %v850_v31 }
 0xe82   :  { %v855_v30 = vsel %vm854_vm5, %v1928_v24, %v851_v43  ;;  %v2835_v24 = vld [vmem:[%s3074_s3] sm:$0xff] }
 0xe83   :  { %v2751_v58 = vsel %vm857_vm6, %v859_v11, %v855_v30 }
 0xe84   :  { %v863_v34 = vmul.f32 %v2751_v58, %v2715_v59  ;;  %v2811_v59 = vld [vmem:[%s3072_s1] sm:$0xff] }
 0xee1   :  { %v866_v14 = vpop.permute.xlu1 %865 }
 0xee2   :  { %v868_v0 = vmul.f32 %v866_v14, %v2751_v58 }
 0xee4   :  { %870 = vrot.lane.b32.xlu2 %v868_v0, %s2083_s13 }
 0xee9   :  { %v960_v10 = vpop.permute.xlu1 %959 }
 0xeea   :  { %v962_v33 = vsel %vm89_vm1, %v1801_v5, %v960_v10 }
 0xeeb   :  { %1803 = vmatmul.msk.f32.vlgmr.msra.gmra.mxu0 %vm91_vm2, %v962_v33 }
 0xeec   :  { %1834 = vmatpush.msk.msra.mxu0 %vm166_vm7, %v2018_v62 }
 0xeee   :  { %1543 = vmatpush.msra.mxu0 %v2019_v40 }
 0xef0   :  { %1544 = vmatpush.msra.mxu0 %v2020_v63 }
 0xef2   :  { %1545 = vmatpush.msra.mxu0 %v2021_v7 }
 0xef4   :  { %1546 = vmatpush.msra.mxu0 %v2022_v13 }
 0xef6   :  { %1547 = vmatpush.msra.mxu0 %v2023_v15 }
 0xef8   :  { %1548 = vmatpush.msra.mxu0 %v2024_v16 }
 0xf3e   :  { %v871_v35 = vpop.permute.xlu2 %870 }
 0xf3f   :  { %v873_v36 = vadd.f32 %v871_v35, %v863_v34 }
 0xf41   :  { %v884_v52 = vsel %vm160_vm8, %v882_v51, %v873_v36 }
 0xf42   :  { %1796 = vmatmul.msk.f32.vlgmr.msra.gmra.mxu2 %vm162_vm9, %v884_v52 }
 0xf43   :  { %1815 = vmatpush.msk.msra.mxu2 %vm95_vm0, %v2768_v53 }
 0xf45   :  { %1190 = vmatpush.msra.mxu2 %v2775_v54 }
 0xf47   :  { %1191 = vmatpush.msra.mxu2 %v2781_v55 }
 0xf49   :  { %1192 = vmatpush.msra.mxu2 %v2787_v37 }
 0xf4b   :  { %1193 = vmatpush.msra.mxu2 %v2793_v57 }
 0xf4d   :  { %1194 = vmatpush.msra.mxu2 %v2799_v38 }
 0xf4f   :  { %1195 = vmatpush.msra.mxu2 %v2805_v41 }
 0xf51   :  { %1196 = vmatpush.msra.mxu2 %v2811_v59 }
 0xf68   :  { %v983_v44 = vpop.f32.mrf.mxu0 }
 0xf69   :  { %v984_v26 = vadd.f32 %v2654_v9, %v983_v44 }
 0xf6b   :  { %1929 = vtanh.f32 %v984_v26  ;;  %v1804_v29 = vmul.f32 -1.442695, %v984_v26 }
 0xf6c   :  { %1931 = vtanh.f32 %v873_v36 }
 0xf6d   :  { %1933 = vpow2.f32 %v1804_v29 }
 0xf71   :  { %v1930_v27 = vpop.eup %1929 }
 0xf72   :  { %1012 = vrot.lane.b32.xlu2 %v1930_v27, %s2082_s12  ;;  %v1932_v32 = vpop.eup %1931 }
 0xf73   :  { %v1934_v39 = vpop.eup %1933 }
 0xf74   :  { %v989_v42 = vadd.f32 1.0, %v1934_v39 }
 0xf76   :  { %1935 = vrcp.f32 %v989_v42  ;;  %v1001_v13 = vand.u32 2147483648, %v989_v42  ;;  %vm995_vm11 = vweird.f32 %v989_v42  ;;  %v999_v15 = vand.u32 2147483647, %v989_v42 }
 0xf78   :  { %v1002_v19 = vor.u32 1.1754944e-38, %v1001_v13  ;;  %vm1000_vm13 = vcmp.eq.f32.partialorder %v999_v15, 8.507059e+37 }
 0xf7a   :  { %876 = vrot.lane.b32.xlu2 %v1932_v32, %s2085_s15 }
 0xf7c   :  { %v1936_v48 = vpop.eup %1935 }
 0xf7d   :  { %v991_v56 = vmul.f32 %v1936_v48, %v989_v42  ;;  %vm996_vm10 = vweird.f32 %v1936_v48 }
 0xf7e   :  { %vm997_vm12 = vmor %vm995_vm11, %vm996_vm10 }
 0xf7f   :  { %v992_v61 = vsub.f32 1.0, %v991_v56 }
 0xf81   :  { %v993_v62 = vmul.f32 %v1936_v48, %v992_v61 }
 0xf83   :  { %v994_v63 = vadd.f32 %v1936_v48, %v993_v62 }
 0xf85   :  { %v998_v17 = vsel %vm997_vm12, %v1936_v48, %v994_v63 }
 0xf86   :  { %v1003_v20 = vsel %vm1000_vm13, %v1002_v19, %v998_v17 }
 0xfc5   :  { %v905_v40 = vpop.f32.mrf.mxu2 }
 0xfc6   :  { %v906_v7 = vadd.f32 %v905_v40, %v2498_v47 }
 0xfc8   :  { %v908_v16 = vmax.f32 %v906_v7, 0.0 }
 0xfca   :  { %1798 = vmatmul.msk.f32.vlgmr.msrb.gmra.mxu3 %vm259_vm15, %v908_v16 }
 0xfcb   :  { %1831 = vmatpush.msk.msrb.mxu3 %vm166_vm7, %v2673_v12 }
 0xfcc   :  { %v1013_v21 = vpop.permute.xlu2 %1012 }
 0xfcd   :  { %v1015_v22 = vmul.f32 %v1013_v21, %v1003_v20  ;;  %1478 = vmatpush.msrb.mxu3 %v2680_v1 }
 0xfcf   :  { %1017 = vrot.lane.b32.xlu1 %v1015_v22, %s2083_s13  ;;  %1479 = vmatpush.msrb.mxu3 %v2687_v2 }
 0xfd1   :  { %1480 = vmatpush.msrb.mxu3 %v2693_v3 }
 0xfd3   :  { %1481 = vmatpush.msrb.mxu3 %v2699_v4 }
 0xfd4   :  { %v877_v47 = vpop.permute.xlu2 %876 }
 0xfd5   :  { %v2827_v23 = vmul.f32 %v877_v47, %v2751_v58  ;;  %1482 = vmatpush.msrb.mxu3 %v2708_v8 }
 0xfd7   :  { %1031 = vrot.lane.b32.xlu2 %v2827_v23, %s2082_s12  ;;  %1483 = vmatpush.msrb.mxu3 %v2835_v24 }
0x1031   :  { %v1032_v27 = vpop.permute.xlu2 %1031 }
0x1041   :  { %v1018_v36 = vpop.permute.xlu1 %1017 }
0x104d   :  { %v929_v25 = vpop.f32.mrf.mxu3 }
0x104e   :  { %v930_v28 = vadd.f32 %v929_v25, %v2523_v50  ;;  %v1814_v25 = vld [vmem:[%s3071_s0 + $0x5] sm:$0x1] }
0x1050   :  { %v1799_v31 = vmul.f32 -1.442695, %v930_v28 }
0x1052   :  { %1937 = vpow2.f32 %v1799_v31 }
0x1058   :  { %v1938_v43 = vpop.eup %1937 }
0x1059   :  { %v935_v45 = vadd.f32 1.0, %v1938_v43  ;;  %v2035_v43 = vld [vmem:[%s3078_s7 + $0x78] sm:$0x1f] }
0x105b   :  { %1939 = vrcp.f32 %v935_v45  ;;  %v947_v14 = vand.u32 2147483648, %v935_v45  ;;  %v945_v0 = vand.u32 2147483647, %v935_v45  ;;  %vm941_vm4 = vweird.f32 %v935_v45 }
0x105d   :  { %v948_v10 = vor.u32 1.1754944e-38, %v947_v14  ;;  %vm946_vm6 = vcmp.eq.f32.partialorder %v945_v0, 8.507059e+37  ;;  %v2040_v14 = vld [vmem:[%s3078_s7 + $0x50] sm:$0xff]  ;;  %v2042_v0 = vld [vmem:[%s3078_s7 + $0x40] sm:$0xff] }
0x1061   :  { %v1940_v46 = vpop.eup %1939 }
0x1062   :  { %v937_v30 = vmul.f32 %v1940_v46, %v935_v45  ;;  %vm942_vm3 = vweird.f32 %v1940_v46  ;;  %v2036_v45 = vld [vmem:[%s3078_s7 + $0x70] sm:$0xff] }
0x1063   :  { %vm943_vm5 = vmor %vm941_vm4, %vm942_vm3 }
0x1064   :  { %v938_v11 = vsub.f32 1.0, %v937_v30  ;;  %v2038_v30 = vld [vmem:[%s3078_s7 + $0x60] sm:$0xff] }
0x1066   :  { %v939_v58 = vmul.f32 %v1940_v46, %v938_v11  ;;  %v2039_v11 = vld [vmem:[%s3078_s7 + $0x58] sm:$0xff] }
0x1068   :  { %v940_v5 = vadd.f32 %v1940_v46, %v939_v58  ;;  %v2041_v58 = vld [vmem:[%s3078_s7 + $0x48] sm:$0xff] }
0x106a   :  { %v944_v33 = vsel %vm943_vm5, %v1940_v46, %v940_v5  ;;  %v2037_v46 = vld [vmem:[%s3078_s7 + $0x68] sm:$0xff]  ;;  %v2043_v5 = vld [vmem:[%s3078_s7 + $0x38] sm:$0xff] }
0x106b   :  { %v2839_v34 = vsel %vm946_vm6, %v948_v10, %v944_v33  ;;  %v2044_v10 = vld [vmem:[%s3078_s7 + $0x30] sm:$0xff]  ;;  %v2045_v33 = vld [vmem:[%s3078_s7 + $0x28] sm:$0xff] }
0x106c   :  { %1007 = vrot.lane.b32.xlu0 %v2839_v34, %s2083_s13 }
0x10de   :  { %v1008_v50 = vpop.permute.xlu0 %1007 }
0x10df   :  { %v1010_v35 = vmul.f32 %v1008_v50, %v1003_v20  ;;  %v2046_v50 = vld [vmem:[%s3078_s7 + $0x20] sm:$0xff] }
0x10e1   :  { %v1020_v51 = vadd.f32 %v1018_v36, %v1010_v35  ;;  %v2047_v35 = vld [vmem:[%s3078_s7 + $0x18] sm:$0xff]  ;;  %v2048_v36 = vld [vmem:[%s3078_s7 + $0x10] sm:$0xff] }
0x10e3   :  { %1941 = vtanh.f32 %v1020_v51  ;;  %1096 = vrot.lane.b32.xlu2 %v1020_v51, %s2084_s14  ;;  %v2049_v51 = vld [vmem:[%s3078_s7 + $0x8] sm:$0xff] }
0x10e9   :  { %v1942_v52 = vpop.eup %1941 }
0x10ea   :  { %1023 = vrot.lane.b32.xlu0 %v1942_v52, %s2085_s15  ;;  %v2050_v52 = vld [vmem:[%s3078_s7] sm:$0xff] }
0x115c   :  { %v1024_v44 = vpop.permute.xlu0 %1023 }
0x115d   :  { %v1026_v26 = vmul.f32 %v1024_v44, %v1003_v20 }
0x115f   :  { %1028 = vrot.lane.b32.xlu1 %v1026_v26, %s2086_s27 }
0x11d1   :  { %v1029_v32 = vpop.permute.xlu1 %1028 }
0x11d2   :  { %v1034_v29 = vsel %vm160_vm8, %v1029_v32, %v1032_v27  ;;  %v1097_v32 = vpop.permute.xlu2 %1096 }
0x11d3   :  { %1806 = vmatmul.msk.f32.vlgmr.msrb.gmra.mxu2 %vm162_vm9, %v1034_v29 }
0x11d4   :  { %1828 = vmatpush.msk.msrb.mxu2 %vm95_vm0, %v2768_v53 }
0x11d6   :  { %1405 = vmatpush.msrb.mxu2 %v2775_v54 }
0x11d8   :  { %1406 = vmatpush.msrb.mxu2 %v2781_v55 }
0x11da   :  { %1407 = vmatpush.msrb.mxu2 %v2787_v37 }
0x11dc   :  { %1408 = vmatpush.msrb.mxu2 %v2793_v57 }
0x11de   :  { %1409 = vmatpush.msrb.mxu2 %v2799_v38 }
0x11e0   :  { %1410 = vmatpush.msrb.mxu2 %v2805_v41 }
0x11e2   :  { %1411 = vmatpush.msrb.mxu2 %v2811_v59 }
0x1256   :  { %v1055_v39 = vpop.f32.mrf.mxu2 }
0x1257   :  { %v1056_v42 = vadd.f32 %v2746_v18, %v1055_v39 }
0x1259   :  { %1943 = vtanh.f32 %v1056_v42  ;;  %v1807_v56 = vmul.f32 -1.442695, %v1056_v42 }
0x125b   :  { %1945 = vpow2.f32 %v1807_v56 }
0x125f   :  { %v1944_v48 = vpop.eup %1943 }
0x1260   :  { %1080 = vrot.lane.b32.xlu0 %v1944_v48, %s2082_s12 }
0x1261   :  { %v1946_v61 = vpop.eup %1945 }
0x1262   :  { %v1061_v62 = vadd.f32 1.0, %v1946_v61 }
0x1264   :  { %1947 = vrcp.f32 %v1061_v62  ;;  %v1073_v16 = vand.u32 2147483648, %v1061_v62  ;;  %vm1067_vm11 = vweird.f32 %v1061_v62  ;;  %v1071_v17 = vand.u32 2147483647, %v1061_v62 }
0x1266   :  { %v1074_v20 = vor.u32 1.1754944e-38, %v1073_v16  ;;  %vm1072_vm13 = vcmp.eq.f32.partialorder %v1071_v17, 8.507059e+37 }
0x1268   :  { %1174 = vrot.lane.b32.xlu0 %v1026_v26, %s2087_s28 }
0x126a   :  { %v1948_v40 = vpop.eup %1947 }
0x126b   :  { %v1063_v63 = vmul.f32 %v1948_v40, %v1061_v62  ;;  %vm1068_vm10 = vweird.f32 %v1948_v40 }
0x126c   :  { %vm1069_vm12 = vmor %vm1067_vm11, %vm1068_vm10 }
0x126d   :  { %v1064_v7 = vsub.f32 1.0, %v1063_v63 }
0x126f   :  { %v1065_v13 = vmul.f32 %v1948_v40, %v1064_v7 }
0x1271   :  { %v1066_v15 = vadd.f32 %v1948_v40, %v1065_v13  ;;  %v2929_v13 = vld [vmem:[%s3077_s6] sm:$0x1] }
0x1273   :  { %v1070_v19 = vsel %vm1069_vm12, %v1948_v40, %v1066_v15 }
0x1274   :  { %v2860_v22 = vsel %vm1072_vm13, %v1074_v20, %v1070_v19 }
0x1275   :  { %v1078_v44 = vmul.f32 %v2860_v22, %v2839_v34 }
0x12d2   :  { %v1081_v21 = vpop.permute.xlu0 %1080 }
0x12d3   :  { %v1083_v47 = vmul.f32 %v1081_v21, %v2860_v22 }
0x12d5   :  { %1085 = vrot.lane.b32.xlu1 %v1083_v47, %s2083_s13 }
0x12da   :  { %v1175_v28 = vpop.permute.xlu0 %1174 }
0x12db   :  { %v1177_v31 = vsel %vm89_vm1, %v1814_v25, %v1175_v28 }
0x12dc   :  { %1816 = vmatmul.msk.f32.vlgmr.msra.gmra.mxu2 %vm91_vm2, %v1177_v31 }
0x12dd   :  { %1836 = vmatpush.msk.msra.mxu2 %vm263_vm14, %v2035_v43 }
0x12df   :  { %1558 = vmatpush.msra.mxu2 %v2036_v45 }
0x12e1   :  { %1559 = vmatpush.msra.mxu2 %v2037_v46 }
0x12e3   :  { %1560 = vmatpush.msra.mxu2 %v2038_v30 }
0x12e5   :  { %1561 = vmatpush.msra.mxu2 %v2039_v11 }
0x12e7   :  { %1562 = vmatpush.msra.mxu2 %v2040_v14 }
0x12e9   :  { %1563 = vmatpush.msra.mxu2 %v2041_v58 }
0x12eb   :  { %1564 = vmatpush.msra.mxu2 %v2042_v0 }
0x12ed   :  { %1565 = vmatpush.msra.mxu2 %v2043_v5 }
0x12ef   :  { %1566 = vmatpush.msra.mxu2 %v2044_v10 }
0x12f1   :  { %1567 = vmatpush.msra.mxu2 %v2045_v33 }
0x12f3   :  { %1568 = vmatpush.msra.mxu2 %v2046_v50 }
0x12f5   :  { %1569 = vmatpush.msra.mxu2 %v2047_v35 }
0x12f7   :  { %1570 = vmatpush.msra.mxu2 %v2048_v36 }
0x12f9   :  { %1571 = vmatpush.msra.mxu2 %v2049_v51 }
0x12fb   :  { %1572 = vmatpush.msra.mxu2 %v2050_v52 }
0x1347   :  { %v1086_v26 = vpop.permute.xlu1 %1085 }
0x1348   :  { %v1088_v27 = vadd.f32 %v1086_v26, %v1078_v44 }
0x134a   :  { %v1099_v29 = vsel %vm160_vm8, %v1097_v32, %v1088_v27 }
0x134b   :  { %1809 = vmatmul.msk.f32.vlgmr.msrb.gmra.mxu1 %vm162_vm9, %v1099_v29 }
0x134c   :  { %1823 = vmatpush.msk.msrb.mxu1 %vm263_vm14, %v2035_v43 }
0x134e   :  { %1343 = vmatpush.msrb.mxu1 %v2036_v45 }
0x1350   :  { %1344 = vmatpush.msrb.mxu1 %v2037_v46 }
0x1352   :  { %1345 = vmatpush.msrb.mxu1 %v2038_v30 }
0x1354   :  { %1346 = vmatpush.msrb.mxu1 %v2039_v11 }
0x1356   :  { %1347 = vmatpush.msrb.mxu1 %v2040_v14 }
0x1358   :  { %1348 = vmatpush.msrb.mxu1 %v2041_v58 }
0x135a   :  { %1349 = vmatpush.msrb.mxu1 %v2042_v0 }
0x135c   :  { %1350 = vmatpush.msrb.mxu1 %v2043_v5 }
0x135e   :  { %1351 = vmatpush.msrb.mxu1 %v2044_v10 }
0x135f   :  { %v1198_v39 = vpop.f32.mrf.mxu2 }
0x1360   :  { %v1199_v34 = vadd.f32 %v2654_v9, %v1198_v39  ;;  %1352 = vmatpush.msrb.mxu1 %v2045_v33 }
0x1362   :  { %1949 = vtanh.f32 %v1199_v34  ;;  %1353 = vmatpush.msrb.mxu1 %v2046_v50  ;;  %v1817_v56 = vmul.f32 -1.442695, %v1199_v34 }
0x1363   :  { %1951 = vtanh.f32 %v1088_v27 }
0x1364   :  { %1354 = vmatpush.msrb.mxu1 %v2047_v35  ;;  %1953 = vpow2.f32 %v1817_v56 }
0x1366   :  { %1355 = vmatpush.msrb.mxu1 %v2048_v36 }
0x1368   :  { %v1950_v42 = vpop.eup %1949  ;;  %1356 = vmatpush.msrb.mxu1 %v2049_v51 }
0x1369   :  { %1227 = vrot.lane.b32.xlu1 %v1950_v42, %s2082_s12  ;;  %v1952_v48 = vpop.eup %1951 }
0x136a   :  { %1357 = vmatpush.msrb.mxu1 %v2050_v52  ;;  %v1954_v61 = vpop.eup %1953 }
0x136b   :  { %v1204_v62 = vadd.f32 1.0, %v1954_v61 }
0x136d   :  { %1955 = vrcp.f32 %v1204_v62  ;;  %v1216_v21 = vand.u32 2147483648, %v1204_v62  ;;  %vm1210_vm3 = vweird.f32 %v1204_v62  ;;  %v1214_v47 = vand.u32 2147483647, %v1204_v62 }
0x136f   :  { %v1217_v28 = vor.u32 1.1754944e-38, %v1216_v21 }
0x1371   :  { %1091 = vrot.lane.b32.xlu1 %v1952_v48, %s2085_s15 }
0x1373   :  { %v1956_v40 = vpop.eup %1955 }
0x1374   :  { %v1206_v7 = vmul.f32 %v1956_v40, %v1204_v62  ;;  %vm1211_vm14 = vweird.f32 %v1956_v40 }
0x1375   :  { %vm1212_vm4 = vmor %vm1210_vm3, %vm1211_vm14 }
0x1376   :  { %v1207_v17 = vsub.f32 1.0, %v1206_v7 }
0x1378   :  { %v1208_v19 = vmul.f32 %v1956_v40, %v1207_v17 }
0x137a   :  { %v1209_v20 = vadd.f32 %v1956_v40, %v1208_v19 }
0x137c   :  { %v1213_v25 = vsel %vm1212_vm4, %v1956_v40, %v1209_v20 }
0x13c8   :  { %v1120_v63 = vpop.f32.mrf.mxu1 }
0x13c9   :  { %v1121_v15 = vadd.f32 %v2929_v13, %v1120_v63 }
0x13cb   :  { %v1123_v16 = vmax.f32 %v1121_v15, 0.0 }
0x13cd   :  { %1811 = vmatmul.msk.f32.vlgmr.msrb.gmra.mxu0 %vm259_vm15, %v1123_v16 }
0x13ce   :  { %1844 = vmatpush.msk.msrb.mxu0 %vm166_vm7, %v2673_v12  ;;  %vm1215_vm7 = vcmp.eq.f32.partialorder %v1214_v47, 8.507059e+37 }
0x13cf   :  { %v1218_v12 = vsel %vm1215_vm7, %v1217_v28, %v1213_v25 }
0x13d0   :  { %1693 = vmatpush.msrb.mxu0 %v2680_v1 }
0x13d2   :  { %1694 = vmatpush.msrb.mxu0 %v2687_v2 }
0x13d4   :  { %1695 = vmatpush.msrb.mxu0 %v2693_v3 }
0x13d6   :  { %1696 = vmatpush.msrb.mxu0 %v2699_v4 }
0x13d8   :  { %1697 = vmatpush.msrb.mxu0 %v2708_v8  ;;  %v2950_v8 = vld [vmem:[%s3079_s8] sm:$0x1] }
0x13da   :  { %1698 = vmatpush.msrb.mxu0 %v2835_v24 }
0x13db   :  { %v1228_v1 = vpop.permute.xlu1 %1227 }
0x13dc   :  { %v1230_v2 = vmul.f32 %v1228_v1, %v1218_v12 }
0x13de   :  { %1232 = vrot.lane.b32.xlu0 %v1230_v2, %s2083_s13 }
0x13e3   :  { %v1092_v31 = vpop.permute.xlu1 %1091 }
0x13e4   :  { %v2943_v3 = vmul.f32 %v1092_v31, %v2860_v22 }
0x13e6   :  { %1246 = vrot.lane.b32.xlu1 %v2943_v3, %s2082_s12 }
0x144a   :  { %v1144_v4 = vpop.f32.mrf.mxu0 }
0x144b   :  { %v1145_v24 = vadd.f32 %v2950_v8, %v1144_v4 }
0x144d   :  { %v1812_v43 = vmul.f32 -1.442695, %v1145_v24 }
0x144f   :  { %1957 = vpow2.f32 %v1812_v43 }
0x1450   :  { %v1233_v51 = vpop.permute.xlu0 %1232 }
0x1455   :  { %v1958_v45 = vpop.eup %1957 }
0x1456   :  { %v1150_v46 = vadd.f32 1.0, %v1958_v45 }
0x1458   :  { %1959 = vrcp.f32 %v1150_v46  ;;  %v1162_v14 = vand.u32 2147483648, %v1150_v46  ;;  %v1160_v0 = vand.u32 2147483647, %v1150_v46  ;;  %vm1156_vm6 = vweird.f32 %v1150_v46  ;;  %v1247_v32 = vpop.permute.xlu1 %1246 }
0x145a   :  { %v1163_v10 = vor.u32 1.1754944e-38, %v1162_v14  ;;  %vm1161_vm11 = vcmp.eq.f32.partialorder %v1160_v0, 8.507059e+37 }
0x145e   :  { %v1960_v30 = vpop.eup %1959 }
0x145f   :  { %v1152_v11 = vmul.f32 %v1960_v30, %v1150_v46  ;;  %vm1157_vm5 = vweird.f32 %v1960_v30 }
0x1460   :  { %vm1158_vm10 = vmor %vm1156_vm6, %vm1157_vm5 }
0x1461   :  { %v1153_v22 = vsub.f32 1.0, %v1152_v11 }
0x1463   :  { %v1154_v58 = vmul.f32 %v1960_v30, %v1153_v22 }
0x1465   :  { %v1155_v5 = vadd.f32 %v1960_v30, %v1154_v58 }
0x1467   :  { %v1159_v33 = vsel %vm1158_vm10, %v1960_v30, %v1155_v5 }
0x1468   :  { %v1164_v50 = vsel %vm1161_vm11, %v1163_v10, %v1159_v33 }
0x1469   :  { %1222 = vrot.lane.b32.xlu2 %v1164_v50, %s2083_s13 }
0x14c3   :  { %v1223_v35 = vpop.permute.xlu2 %1222 }
0x14c4   :  { %v1225_v36 = vmul.f32 %v1223_v35, %v1218_v12 }
0x14c6   :  { %v1235_v52 = vadd.f32 %v1233_v51, %v1225_v36 }
0x14c8   :  { %1961 = vtanh.f32 %v1235_v52  ;;  %1311 = vrot.lane.b32.xlu1 %v1235_v52, %s2084_s14 }
0x14ce   :  { %v1962_v44 = vpop.eup %1961 }
0x14cf   :  { %1238 = vrot.lane.b32.xlu2 %v1962_v44, %s2085_s15 }
0x1529   :  { %v1239_v26 = vpop.permute.xlu2 %1238 }
0x152a   :  { %v1241_v27 = vmul.f32 %v1239_v26, %v1218_v12  ;;  %v1827_v12 = vld [vmem:[%s3071_s0 + $0x6] sm:$0x1] }
0x152c   :  { %1243 = vrot.lane.b32.xlu0 %v1241_v27, %s2086_s27 }
0x153a   :  { %v1312_v43 = vpop.permute.xlu1 %1311 }
0x159e   :  { %v1244_v29 = vpop.permute.xlu0 %1243 }
0x159f   :  { %v1249_v39 = vsel %vm160_vm8, %v1244_v29, %v1247_v32 }
0x15a0   :  { %1819 = vmatmul.msk.f32.vlgmr.msra.gmra.mxu1 %vm162_vm9, %v1249_v39 }
0x161d   :  { %v1270_v34 = vpop.f32.mrf.mxu1 }
0x161e   :  { %v1271_v42 = vadd.f32 %v2746_v18, %v1270_v34 }
0x1620   :  { %1963 = vtanh.f32 %v1271_v42  ;;  %v1820_v56 = vmul.f32 -1.442695, %v1271_v42 }
0x1622   :  { %1965 = vpow2.f32 %v1820_v56 }
0x1626   :  { %v1964_v48 = vpop.eup %1963 }
0x1627   :  { %1295 = vrot.lane.b32.xlu2 %v1964_v48, %s2082_s12 }
0x1628   :  { %v1966_v61 = vpop.eup %1965 }
0x1629   :  { %v1276_v62 = vadd.f32 1.0, %v1966_v61 }
0x162b   :  { %1967 = vrcp.f32 %v1276_v62  ;;  %v1288_v17 = vand.u32 2147483648, %v1276_v62  ;;  %vm1282_vm13 = vweird.f32 %v1276_v62  ;;  %v1286_v19 = vand.u32 2147483647, %v1276_v62 }
0x162d   :  { %v1289_v21 = vor.u32 1.1754944e-38, %v1288_v17  ;;  %vm1287_vm3 = vcmp.eq.f32.partialorder %v1286_v19, 8.507059e+37 }
0x162f   :  { %1389 = vrot.lane.b32.xlu2 %v1241_v27, %s2087_s28 }
0x1631   :  { %v1968_v40 = vpop.eup %1967 }
0x1632   :  { %v1278_v63 = vmul.f32 %v1968_v40, %v1276_v62  ;;  %vm1283_vm12 = vweird.f32 %v1968_v40 }
0x1633   :  { %vm1284_vm14 = vmor %vm1282_vm13, %vm1283_vm12 }
0x1634   :  { %v1279_v7 = vsub.f32 1.0, %v1278_v63 }
0x1636   :  { %v1280_v15 = vmul.f32 %v1968_v40, %v1279_v7 }
0x1638   :  { %v1281_v16 = vadd.f32 %v1968_v40, %v1280_v15 }
0x163a   :  { %v1285_v20 = vsel %vm1284_vm14, %v1968_v40, %v1281_v16 }
0x163b   :  { %v1290_v25 = vsel %vm1287_vm3, %v1289_v21, %v1285_v20 }
0x163c   :  { %v1293_v31 = vmul.f32 %v1290_v25, %v1164_v50 }
0x1681   :  { %v1296_v47 = vpop.permute.xlu2 %1295 }
0x1682   :  { %v1298_v28 = vmul.f32 %v1296_v47, %v1290_v25 }
0x1684   :  { %1300 = vrot.lane.b32.xlu0 %v1298_v28, %s2083_s13 }
0x1689   :  { %v1390_v1 = vpop.permute.xlu2 %1389 }
0x168a   :  { %v1392_v2 = vsel %vm89_vm1, %v1827_v12, %v1390_v1 }
0x168b   :  { %1829 = vmatmul.msk.f32.vlgmr.msrb.gmra.mxu2 %vm91_vm2, %v1392_v2 }
0x16f6   :  { %v1301_v4 = vpop.permute.xlu0 %1300 }
0x16f7   :  { %v1303_v24 = vadd.f32 %v1301_v4, %v1293_v31 }
0x16f9   :  { %v1314_v45 = vsel %vm160_vm8, %v1312_v43, %v1303_v24 }
0x16fa   :  { %1822 = vmatmul.msk.f32.vlgmr.msra.gmra.mxu3 %vm162_vm9, %v1314_v45 }
0x16fb   :  { %1841 = vmatpush.msk.msra.mxu3 %vm95_vm0, %v2768_v53 }
0x16fd   :  { %1620 = vmatpush.msra.mxu3 %v2775_v54 }
0x16ff   :  { %1621 = vmatpush.msra.mxu3 %v2781_v55 }
0x1701   :  { %1622 = vmatpush.msra.mxu3 %v2787_v37 }
0x1703   :  { %1623 = vmatpush.msra.mxu3 %v2793_v57 }
0x1705   :  { %1624 = vmatpush.msra.mxu3 %v2799_v38 }
0x1707   :  { %1625 = vmatpush.msra.mxu3 %v2805_v41 }
0x1709   :  { %1626 = vmatpush.msra.mxu3 %v2811_v59 }
0x170e   :  { %v1413_v46 = vpop.f32.mrf.mxu2 }
0x170f   :  { %v1414_v30 = vadd.f32 %v2654_v9, %v1413_v46 }
0x1711   :  { %1969 = vtanh.f32 %v1414_v30  ;;  %v1830_v54 = vmul.f32 -1.442695, %v1414_v30 }
0x1712   :  { %1971 = vtanh.f32 %v1303_v24 }
0x1713   :  { %1973 = vpow2.f32 %v1830_v54 }
0x1717   :  { %v1970_v11 = vpop.eup %1969 }
0x1718   :  { %1442 = vrot.lane.b32.xlu0 %v1970_v11, %s2082_s12  ;;  %v1972_v53 = vpop.eup %1971 }
0x1719   :  { %v1974_v55 = vpop.eup %1973 }
0x171a   :  { %v1419_v37 = vadd.f32 1.0, %v1974_v55 }
0x171c   :  { %1975 = vrcp.f32 %v1419_v37  ;;  %v1431_v0 = vand.u32 2147483648, %v1419_v37  ;;  %vm1425_vm4 = vweird.f32 %v1419_v37  ;;  %v1429_v5 = vand.u32 2147483647, %v1419_v37 }
0x171e   :  { %v1432_v33 = vor.u32 1.1754944e-38, %v1431_v0  ;;  %vm1430_vm5 = vcmp.eq.f32.partialorder %v1429_v5, 8.507059e+37 }
0x1720   :  { %1306 = vrot.lane.b32.xlu0 %v1972_v53, %s2085_s15 }
0x1722   :  { %v1976_v57 = vpop.eup %1975 }
0x1723   :  { %v1421_v38 = vmul.f32 %v1976_v57, %v1419_v37  ;;  %vm1426_vm0 = vweird.f32 %v1976_v57 }
0x1724   :  { %vm1427_vm7 = vmor %vm1425_vm4, %vm1426_vm0 }
0x1725   :  { %v1422_v41 = vsub.f32 1.0, %v1421_v38 }
0x1727   :  { %v1423_v9 = vmul.f32 %v1976_v57, %v1422_v41 }
0x1729   :  { %v1424_v58 = vadd.f32 %v1976_v57, %v1423_v9 }
0x172b   :  { %v1428_v10 = vsel %vm1427_vm7, %v1976_v57, %v1424_v58 }
0x172c   :  { %v1433_v50 = vsel %vm1430_vm5, %v1432_v33, %v1428_v10 }
0x177d   :  { %v1335_v59 = vpop.f32.mrf.mxu3 }
0x177e   :  { %v1336_v22 = vadd.f32 %v2929_v13, %v1335_v59  ;;  %v1840_v59 = vld [vmem:[%s3071_s0 + $0x7] sm:$0x1] }
0x1780   :  { %v1338_v14 = vmax.f32 %v1336_v22, 0.0 }
0x1782   :  { %1824 = vmatmul.msk.f32.vlgmr.msrb.gmra.mxu1 %vm259_vm15, %v1338_v14 }
0x178a   :  { %v1443_v35 = vpop.permute.xlu0 %1442 }
0x178b   :  { %v1445_v36 = vmul.f32 %v1443_v35, %v1433_v50 }
0x178d   :  { %1447 = vrot.lane.b32.xlu2 %v1445_v36, %s2083_s13 }
0x1792   :  { %v1307_v51 = vpop.permute.xlu0 %1306 }
0x1793   :  { %v2985_v52 = vmul.f32 %v1307_v51, %v1290_v25 }
0x1795   :  { %1461 = vrot.lane.b32.xlu0 %v2985_v52, %s2082_s12 }
0x17e7   :  { %v1448_v17 = vpop.permute.xlu2 %1447 }
0x17ff   :  { %v1359_v44 = vpop.f32.mrf.mxu1 }
0x1800   :  { %v1360_v26 = vadd.f32 %v2950_v8, %v1359_v44 }
0x1802   :  { %v1825_v27 = vmul.f32 -1.442695, %v1360_v26 }
0x1804   :  { %1977 = vpow2.f32 %v1825_v27 }
0x1807   :  { %v1462_v25 = vpop.permute.xlu0 %1461 }
0x180a   :  { %v1978_v32 = vpop.eup %1977 }
0x180b   :  { %v1365_v29 = vadd.f32 1.0, %v1978_v32 }
0x180d   :  { %1979 = vrcp.f32 %v1365_v29  ;;  %v1377_v48 = vand.u32 2147483648, %v1365_v29  ;;  %v1375_v61 = vand.u32 2147483647, %v1365_v29  ;;  %vm1371_vm10 = vweird.f32 %v1365_v29 }
0x180f   :  { %v1378_v40 = vor.u32 1.1754944e-38, %v1377_v48  ;;  %vm1376_vm12 = vcmp.eq.f32.partialorder %v1375_v61, 8.507059e+37 }
0x1813   :  { %v1980_v39 = vpop.eup %1979 }
0x1814   :  { %v1367_v34 = vmul.f32 %v1980_v39, %v1365_v29  ;;  %vm1372_vm6 = vweird.f32 %v1980_v39 }
0x1815   :  { %vm1373_vm11 = vmor %vm1371_vm10, %vm1372_vm6 }
0x1816   :  { %v1368_v42 = vsub.f32 1.0, %v1367_v34 }
0x1818   :  { %v1369_v56 = vmul.f32 %v1980_v39, %v1368_v42 }
0x181a   :  { %v1370_v62 = vadd.f32 %v1980_v39, %v1369_v56 }
0x181c   :  { %v1374_v63 = vsel %vm1373_vm11, %v1980_v39, %v1370_v62 }
0x181d   :  { %v1379_v7 = vsel %vm1376_vm12, %v1378_v40, %v1374_v63 }
0x181e   :  { %1437 = vrot.lane.b32.xlu1 %v1379_v7, %s2083_s13 }
0x1890   :  { %v1438_v15 = vpop.permute.xlu1 %1437 }
0x1891   :  { %v1440_v16 = vmul.f32 %v1438_v15, %v1433_v50 }
0x1893   :  { %v1450_v19 = vadd.f32 %v1448_v17, %v1440_v16 }
0x1895   :  { %1981 = vtanh.f32 %v1450_v19  ;;  %1526 = vrot.lane.b32.xlu0 %v1450_v19, %s2084_s14 }
0x189b   :  { %v1982_v20 = vpop.eup %1981 }
0x189c   :  { %1453 = vrot.lane.b32.xlu1 %v1982_v20, %s2085_s15 }
0x1907   :  { %v1527_v5 = vpop.permute.xlu0 %1526 }
0x190e   :  { %v1454_v21 = vpop.permute.xlu1 %1453 }
0x190f   :  { %v1456_v47 = vmul.f32 %v1454_v21, %v1433_v50  ;;  %v2053_v50 = vld [vmem:[%s3073_s2] sm:$0x1] }
0x1911   :  { %1458 = vrot.lane.b32.xlu2 %v1456_v47, %s2086_s27 }
0x196b   :  { %v1459_v28 = vpop.permute.xlu2 %1458 }
0x196c   :  { %v1464_v12 = vsel %vm160_vm8, %v1459_v28, %v1462_v25 }
0x196d   :  { %1832 = vmatmul.msk.f32.vlgmr.msrb.gmra.mxu3 %vm162_vm9, %v1464_v12 }
0x19f0   :  { %v1485_v1 = vpop.f32.mrf.mxu3 }
0x19f1   :  { %v1486_v2 = vadd.f32 %v2746_v18, %v1485_v1 }
0x19f3   :  { %1983 = vtanh.f32 %v1486_v2  ;;  %v1833_v4 = vmul.f32 -1.442695, %v1486_v2 }
0x19f5   :  { %1985 = vpow2.f32 %v1833_v4 }
0x19f9   :  { %v1984_v31 = vpop.eup %1983 }
0x19fa   :  { %1510 = vrot.lane.b32.xlu1 %v1984_v31, %s2082_s12 }
0x19fb   :  { %v1986_v24 = vpop.eup %1985 }
0x19fc   :  { %v1491_v43 = vadd.f32 1.0, %v1986_v24 }
0x19fe   :  { %1987 = vrcp.f32 %v1491_v43  ;;  %v1503_v54 = vand.u32 2147483648, %v1491_v43  ;;  %vm1497_vm14 = vweird.f32 %v1491_v43  ;;  %v1501_v18 = vand.u32 2147483647, %v1491_v43 }
0x1a00   :  { %v1504_v37 = vor.u32 1.1754944e-38, %v1503_v54  ;;  %vm1502_vm0 = vcmp.eq.f32.partialorder %v1501_v18, 8.507059e+37 }
0x1a02   :  { %1604 = vrot.lane.b32.xlu1 %v1456_v47, %s2087_s28 }
0x1a04   :  { %v1988_v45 = vpop.eup %1987 }
0x1a05   :  { %v1493_v46 = vmul.f32 %v1988_v45, %v1491_v43  ;;  %vm1498_vm13 = vweird.f32 %v1988_v45 }
0x1a06   :  { %vm1499_vm3 = vmor %vm1497_vm14, %vm1498_vm13  ;;  %vm310_vm13 = vcmask 196608  }
0x1a07   :  { %v1494_v30 = vsub.f32 1.0, %v1493_v46 }
0x1a09   :  { %v1495_v11 = vmul.f32 %v1988_v45, %v1494_v30 }
0x1a0b   :  { %v1496_v53 = vadd.f32 %v1988_v45, %v1495_v11 }
0x1a0d   :  { %v1500_v55 = vsel %vm1499_vm3, %v1988_v45, %v1496_v53 }
0x1a0e   :  { %v1505_v38 = vsel %vm1502_vm0, %v1504_v37, %v1500_v55 }
0x1a0f   :  { %v1508_v14 = vmul.f32 %v1505_v38, %v1379_v7 }
0x1a6c   :  { %v1511_v57 = vpop.permute.xlu1 %1510 }
0x1a6d   :  { %v1513_v41 = vmul.f32 %v1511_v57, %v1505_v38 }
0x1a6f   :  { %1515 = vrot.lane.b32.xlu2 %v1513_v41, %s2083_s13 }
0x1a74   :  { %v1605_v22 = vpop.permute.xlu1 %1604 }
0x1a75   :  { %v1607_v9 = vsel %vm89_vm1, %v1840_v59, %v1605_v22  ;;  %v2054_v22 = vld [vmem:[#allocation2] sm:$0x1] }
0x1a76   :  { %1842 = vmatmul.msk.f32.vlgmr.msra.gmra.mxu3 %vm91_vm2, %v1607_v9 }
0x1ac9   :  { %v1516_v58 = vpop.permute.xlu2 %1515 }
0x1aca   :  { %v1518_v0 = vadd.f32 %v1516_v58, %v1508_v14 }
0x1acc   :  { %v1529_v10 = vsel %vm160_vm8, %v1527_v5, %v1518_v0 }
0x1acd   :  { %1835 = vmatmul.msk.f32.vlgmr.msra.gmra.mxu0 %vm162_vm9, %v1529_v10 }
0x1af9   :  { %v1628_v33 = vpop.f32.mrf.mxu3 }
0x1afa   :  { %v1629_v35 = vadd.f32 %v2053_v50, %v1628_v33 }
0x1afc   :  { %1989 = vtanh.f32 %v1629_v35  ;;  %v1843_v44 = vmul.f32 -1.442695, %v1629_v35 }
0x1afd   :  { %1991 = vtanh.f32 %v1518_v0 }
0x1afe   :  { %1993 = vpow2.f32 %v1843_v44 }
0x1b02   :  { %v1990_v36 = vpop.eup %1989 }
0x1b03   :  { %1657 = vrot.lane.b32.xlu2 %v1990_v36, %s2082_s12  ;;  %v1992_v51 = vpop.eup %1991 }
0x1b04   :  { %v1994_v26 = vpop.eup %1993 }
0x1b05   :  { %v1634_v27 = vadd.f32 1.0, %v1994_v26 }
0x1b07   :  { %1995 = vrcp.f32 %v1634_v27  ;;  %v1646_v62 = vand.u32 2147483648, %v1634_v27  ;;  %vm1640_vm2 = vweird.f32 %v1634_v27  ;;  %v1644_v40 = vand.u32 2147483647, %v1634_v27 }
0x1b09   :  { %v1647_v7 = vor.u32 1.1754944e-38, %v1646_v62  ;;  %vm1645_vm7 = vcmp.eq.f32.partialorder %v1644_v40, 8.507059e+37 }
0x1b0b   :  { %1521 = vrot.lane.b32.xlu2 %v1992_v51, %s2085_s15 }
0x1b0d   :  { %v1996_v32 = vpop.eup %1995 }
0x1b0e   :  { %v1636_v39 = vmul.f32 %v1996_v32, %v1634_v27  ;;  %vm1641_vm1 = vweird.f32 %v1996_v32 }
0x1b0f   :  { %vm1642_vm4 = vmor %vm1640_vm2, %vm1641_vm1 }
0x1b10   :  { %v1637_v48 = vsub.f32 1.0, %v1636_v39 }
0x1b12   :  { %v1638_v56 = vmul.f32 %v1996_v32, %v1637_v48 }
0x1b14   :  { %v1639_v61 = vadd.f32 %v1996_v32, %v1638_v56 }
0x1b16   :  { %v1643_v63 = vsel %vm1642_vm4, %v1996_v32, %v1639_v61 }
0x1b17   :  { %v1648_v15 = vsel %vm1645_vm7, %v1647_v7, %v1643_v63 }
0x1b4a   :  { %v1550_v29 = vpop.f32.mrf.mxu0 }
0x1b4b   :  { %v1551_v34 = vadd.f32 %v2929_v13, %v1550_v29 }
0x1b4d   :  { %v1553_v42 = vmax.f32 %v1551_v34, 0.0 }
0x1b4f   :  { %1837 = vmatmul.msk.f32.vlgmr.msra.gmra.mxu2 %vm259_vm15, %v1553_v42 }
0x1b5d   :  { %v1658_v16 = vpop.permute.xlu2 %1657 }
0x1b5e   :  { %v1660_v17 = vmul.f32 %v1658_v16, %v1648_v15 }
0x1b60   :  { %1662 = vrot.lane.b32.xlu1 %v1660_v17, %s2083_s13 }
0x1b65   :  { %v1522_v13 = vpop.permute.xlu2 %1521 }
0x1b66   :  { %v1524_v19 = vmul.f32 %v1522_v13, %v1505_v38 }
0x1b68   :  { %1676 = vrot.lane.b32.xlu2 %v1524_v19, %s2082_s12 }
0x1bc2   :  { %v1677_v57 = vpop.permute.xlu2 %1676 }
0x1bd2   :  { %v1574_v20 = vpop.f32.mrf.mxu2  ;;  %v1663_v53 = vpop.permute.xlu1 %1662 }
0x1bd3   :  { %v1575_v21 = vadd.f32 %v2950_v8, %v1574_v20 }
0x1bd5   :  { %v1838_v47 = vmul.f32 -1.442695, %v1575_v21 }
0x1bd7   :  { %1997 = vpow2.f32 %v1838_v47 }
0x1bdd   :  { %v1998_v25 = vpop.eup %1997 }
0x1bde   :  { %v1580_v28 = vadd.f32 1.0, %v1998_v25 }
0x1be0   :  { %1999 = vrcp.f32 %v1580_v28  ;;  %v1592_v31 = vand.u32 2147483648, %v1580_v28  ;;  %v1590_v24 = vand.u32 2147483647, %v1580_v28  ;;  %vm1586_vm5 = vweird.f32 %v1580_v28 }
0x1be2   :  { %v1593_v45 = vor.u32 1.1754944e-38, %v1592_v31  ;;  %vm1591_vm10 = vcmp.eq.f32.partialorder %v1590_v24, 8.507059e+37 }
0x1be6   :  { %v2000_v12 = vpop.eup %1999 }
0x1be7   :  { %v1582_v1 = vmul.f32 %v2000_v12, %v1580_v28  ;;  %vm1587_vm15 = vweird.f32 %v2000_v12 }
0x1be8   :  { %vm1588_vm6 = vmor %vm1586_vm5, %vm1587_vm15 }
0x1be9   :  { %v1583_v2 = vsub.f32 1.0, %v1582_v1 }
0x1beb   :  { %v1584_v4 = vmul.f32 %v2000_v12, %v1583_v2 }
0x1bed   :  { %v1585_v43 = vadd.f32 %v2000_v12, %v1584_v4 }
0x1bef   :  { %v1589_v46 = vsel %vm1588_vm6, %v2000_v12, %v1585_v43 }
0x1bf0   :  { %v1594_v30 = vsel %vm1591_vm10, %v1593_v45, %v1589_v46 }
0x1bf1   :  { %1652 = vrot.lane.b32.xlu0 %v1594_v30, %s2083_s13 }
0x1c63   :  { %v1653_v8 = vpop.permute.xlu0 %1652 }
0x1c64   :  { %v1655_v11 = vmul.f32 %v1653_v8, %v1648_v15 }
0x1c66   :  { %v1665_v54 = vadd.f32 %v1663_v53, %v1655_v11 }
0x1c68   :  { %2001 = vtanh.f32 %v1665_v54 }
0x1c6e   :  { %v2002_v18 = vpop.eup %2001 }
0x1c6f   :  { %1668 = vrot.lane.b32.xlu0 %v2002_v18, %s2085_s15 }
0x1ce1   :  { %v1669_v55 = vpop.permute.xlu0 %1668 }
0x1ce2   :  { %v1671_v37 = vmul.f32 %v1669_v55, %v1648_v15 }
0x1ce4   :  { %1673 = vrot.lane.b32.xlu1 %v1671_v37, %s2086_s27 }
0x1d56   :  { %v1674_v38 = vpop.permute.xlu1 %1673 }
0x1d57   :  { %v1679_v41 = vsel %vm160_vm8, %v1674_v38, %v1677_v57 }
0x1d58   :  { %1845 = vmatmul.msk.f32.vlgmr.msrb.gmra.mxu0 %vm162_vm9, %v1679_v41 }
0x1dd5   :  { %v1700_v59 = vpop.f32.mrf.mxu0 }
0x1dd6   :  { %v1701_v9 = vadd.f32 %v2054_v22, %v1700_v59 }
0x1dd8   :  { %2003 = vtanh.f32 %v1701_v9  ;;  %v1846_v58 = vmul.f32 -1.442695, %v1701_v9 }
0x1dda   :  { %2005 = vpow2.f32 %v1846_v58 }
0x1dde   :  { %v2004_v14 = vpop.eup %2003 }
0x1ddf   :  { %1725 = vrot.lane.b32.xlu0 %v2004_v14, %s2082_s12 }
0x1de0   :  { %v2006_v0 = vpop.eup %2005 }
0x1de1   :  { %v1706_v5 = vadd.f32 1.0, %v2006_v0 }
0x1de3   :  { %2007 = vrcp.f32 %v1706_v5  ;;  %v1718_v51 = vand.u32 2147483648, %v1706_v5  ;;  %vm1712_vm9 = vweird.f32 %v1706_v5  ;;  %v1716_v44 = vand.u32 2147483647, %v1706_v5 }
0x1de5   :  { %v1719_v26 = vor.u32 1.1754944e-38, %v1718_v51  ;;  %vm1717_vm12 = vcmp.eq.f32.partialorder %v1716_v44, 8.507059e+37 }
0x1de7   :  { %307 = vrot.lane.b32.xlu0 %v2516_v49, %s2086_s27 }
0x1de9   :  { %v2008_v10 = vpop.eup %2007 }
0x1dea   :  { %v1708_v33 = vmul.f32 %v2008_v10, %v1706_v5  ;;  %vm1713_vm8 = vweird.f32 %v2008_v10 }
0x1deb   :  { %vm1714_vm11 = vmor %vm1712_vm9, %vm1713_vm8 }
0x1dec   :  { %v1709_v50 = vsub.f32 1.0, %v1708_v33 }
0x1dee   :  { %v1710_v35 = vmul.f32 %v2008_v10, %v1709_v50 }
0x1def   :  { %952 = vrot.lane.b32.xlu0 %v2827_v23, %s2086_s27 }
0x1df0   :  { %v1711_v36 = vadd.f32 %v2008_v10, %v1710_v35 }
0x1df2   :  { %v1715_v49 = vsel %vm1714_vm11, %v2008_v10, %v1711_v36 }
0x1df3   :  { %v1720_v27 = vsel %vm1717_vm12, %v1719_v26, %v1715_v49 }
0x1df4   :  { %v1723_v42 = vmul.f32 %v1720_v27, %v1594_v30 }
0x1df7   :  { %1597 = vrot.lane.b32.xlu0 %v1524_v19, %s2086_s27 }
0x1e51   :  { %v1726_v23 = vpop.permute.xlu0 %1725 }
0x1e52   :  { %v1728_v32 = vmul.f32 %v1726_v23, %v1720_v27 }
0x1e54   :  { %1730 = vrot.lane.b32.xlu1 %v1728_v32, %s2083_s13 }
0x1e59   :  { %v308_v29 = vpop.permute.xlu0 %307 }
0x1e5a   :  { %311 = vst.msk [vmem:[%s3080_s9] sm:$0x1] %vm310_vm13, %v308_v29 }
0x1e5c   :  { %522 = vrot.lane.b32.xlu1 %v2589_v60, %s2086_s27 }
0x1e61   :  { %v953_v39 = vpop.permute.xlu0 %952 }
0x1e62   :  { %1800 = vst.msk [vmem:[%s3080_s9 + $0x3] sm:$0x1] %vm310_vm13, %v953_v39 }
0x1e64   :  { %1167 = vrot.lane.b32.xlu1 %v2943_v3, %s2086_s27 }
0x1e69   :  { %v1598_v34 = vpop.permute.xlu0 %1597 }
0x1e6a   :  { %1839 = vst.msk [vmem:[%s3080_s9 + $0x6] sm:$0x1] %vm310_vm13, %v1598_v34 }
0x1ec6   :  { %v1731_v48 = vpop.permute.xlu1 %1730 }
0x1ec7   :  { %v1733_v56 = vadd.f32 %v1731_v48, %v1723_v42 }
0x1ec9   :  { %2009 = vtanh.f32 %v1733_v56 }
0x1ece   :  { %v523_v60 = vpop.permute.xlu1 %522 }
0x1ecf   :  { %v2010_v61 = vpop.eup %2009  ;;  %1774 = vst.msk [vmem:[%s3080_s9 + $0x1] sm:$0x1] %vm310_vm13, %v523_v60 }
0x1ed0   :  { %1736 = vrot.lane.b32.xlu2 %v2010_v61, %s2085_s15 }
0x1ed6   :  { %v1168_v3 = vpop.permute.xlu1 %1167 }
0x1ed7   :  { %1813 = vst.msk [vmem:[%s3080_s9 + $0x4] sm:$0x1] %vm310_vm13, %v1168_v3 }
0x1ed8   :  { %737 = vrot.lane.b32.xlu2 %v2703_v6, %s2086_s27 }
0x1ee0   :  { %1382 = vrot.lane.b32.xlu2 %v2985_v52, %s2086_s27 }
0x1f2a   :  { %v1737_v62 = vpop.permute.xlu2 %1736 }
0x1f2b   :  { %v1739_v40 = vmul.f32 %v1737_v62, %v1720_v27 }
0x1f2d   :  { %1741 = vrot.lane.b32.xlu1 %v1739_v40, %s2086_s27 }
0x1f32   :  { %v738_v63 = vpop.permute.xlu2 %737 }
0x1f33   :  { %1787 = vst.msk [vmem:[%s3080_s9 + $0x2] sm:$0x1] %vm310_vm13, %v738_v63 }
0x1f3a   :  { %v1383_v7 = vpop.permute.xlu2 %1382 }
0x1f3b   :  { %1826 = vst.msk [vmem:[%s3080_s9 + $0x5] sm:$0x1] %vm310_vm13, %v1383_v7 }
0x1f9f   :  { %v1742_v6 = vpop.permute.xlu1 %1741 }
0x1fa0   :  { %1847 = vst.msk [vmem:[%s3080_s9 + $0x7] sm:$0x1] %vm310_vm13, %v1742_v6 }
0x1fa1   :  { %1750 = vsyncpa [#allocation3], 1 }

</bundles_post_ra>
